<compile_context>
chip_gen: v7x
topology: tpu7x:2x2x1
jax: 0.10.0
libtpu: 0.0.40
codegen_flags: <defaults>
</compile_context>

<pallas_src>
import jax
import jax.numpy as jnp
from jax.experimental import pallas as pl
from jax.experimental.pallas import tpu as pltpu

# ---- model hyper-params (mirrors the PyTorch module) ----
DENSE_HID = 32
EMBED_DIM = 32
USER_HID = [256, 128, 64]
DENSE_IN = 3           # raw dense features
DENSE_IN_PAD = 8       # zero-padded dense feature width fed to the kernel

# ---- synthetic vocab sizes (stand-ins for the csv-derived sizes) ----
V_BOOKS = 50           # int(books.book_id.max()) + 1
NUM_AUTH = 10          # len(author2idx)
NUM_LANG = 4           # len(lang2idx)
NUM_TAGS = 20

# Candidates (lanes) per grid step.  Working set per step at 2048:
#   activations < 4 MiB f32 intermediates + ~0.4 MiB double-buffered inputs
#   + ~0.25 MiB resident weights  ->  far inside every chip's VMEM.
TILE_C_MAX = 2048


def _dlrm_mlp_kernel(u_ref, i_ref, d_ref,
                     bw1t_ref, bb1_ref,
                     tw1it_ref, wfuset_ref,
                     tw2t_ref, tb2_ref,
                     tw3t_ref, tb3_ref,
                     tw4_ref, tb4_ref,
                     out_ref):
    """One (batch row, candidate tile), feature-major.

    Exact algebraic fusion (real arithmetic):
        h1 = relu( u@tw1_u + i_vec@tw1_i
                   + relu(d@bw1 + bb1) @ (bw2@tw1_i) + (bb2@tw1_i + tb1) )
    The per-user term  u@tw1_u + bb2@tw1_i + tb1  arrives pre-computed as the
    (256, 1) column u_ref and is lane-broadcast over the candidate tile.
    """
    f32 = jnp.float32

    # ---- bottom MLP layer 1 (transposed): (32, 8) @ (8, Tc) -> (32, Tc) ----
    hb = jnp.dot(bw1t_ref[...], d_ref[...], preferred_element_type=f32) + bb1_ref[...]
    hb = jnp.maximum(hb, 0.0).astype(wfuset_ref.dtype)

    # ---- fused top layer 1: (256, Tc) ----
    h = (u_ref[...]                                                   # (256, 1) f32
         + jnp.dot(tw1it_ref[...], i_ref[...], preferred_element_type=f32)
         + jnp.dot(wfuset_ref[...], hb, preferred_element_type=f32))
    h = jnp.maximum(h, 0.0).astype(tw2t_ref.dtype)

    # ---- top layer 2: (128, 256) @ (256, Tc) ----
    h = jnp.maximum(jnp.dot(tw2t_ref[...], h, preferred_element_type=f32)
                    + tb2_ref[...], 0.0).astype(tw3t_ref.dtype)
    # ---- top layer 3: (64, 128) @ (128, Tc); stays f32 for the final reduce ----
    h = jnp.maximum(jnp.dot(tw3t_ref[...], h, preferred_element_type=f32)
                    + tb3_ref[...], 0.0)

    # ---- final 64 -> 1 layer: VPU multiply + cross-sublane reduce -> (1, Tc) ----
    out_ref[...] = (jnp.sum(h * tw4_ref[...], axis=0, keepdims=True)
                    + tb4_ref[...]).astype(out_ref.dtype)


def dlrm_forward(params, hist, wish, cand, auth, lang, tags, dense,
                 *, compute_dtype=jnp.bfloat16):
    """Full DLRM forward. Embedding gathers in plain JAX, MLPs in Pallas."""
    B, C = cand.shape
    E = EMBED_DIM

    # ---- embedding lookups (glue; padding_idx=0 rows are zero in the tables) ----
    # TODO(synk): embedding gathers stay in XLA; a Pallas gather (scalar-prefetch
    # index_map) is not worth it for these tiny tables.
    u_h = jnp.take(params["emb_hist"], hist, axis=0).mean(axis=1)      # (B, E)
    u_w = jnp.take(params["emb_wish"], wish, axis=0).mean(axis=1)      # (B, E)
    u_vec = u_h + u_w                                                  # (B, E)

    e_c = jnp.take(params["emb_cand"], cand, axis=0)                   # (B, C, E)
    e_a = jnp.take(params["emb_auth"], auth, axis=0)
    e_l = jnp.take(params["emb_lang"], lang, axis=0)
    e_t = jnp.take(params["emb_tags"], tags, axis=0).sum(axis=2) / 5.0
    i_vec = e_c + e_a + e_l + e_t                                      # (B, C, E)

    # ---- wrapper-side algebraic precompute ----
    tw1 = params["tw1"]                                                # (2E, 256)
    tw1_u, tw1_i = tw1[:E], tw1[E:]                                    # (E, 256) each
    w_fuse = params["bw2"] @ tw1_i                                     # (32, 256)
    b_fuse = params["bb2"] @ tw1_i + params["tb1"]                     # (256,)
    # per-user half of top layer 1 + constant fused bias, as a column for
    # lane-broadcast inside the kernel: once per user, not per candidate
    u_col = (u_vec @ tw1_u + b_fuse[None, :]).reshape(B, USER_HID[0], 1)

    # ---- feature-major activations: candidates on the lane axis ----
    i_t = jnp.swapaxes(i_vec, 1, 2)                                    # (B, E, C)
    d_t = jnp.zeros((B, DENSE_IN_PAD, C), jnp.float32).at[:, :DENSE_IN, :].set(
        jnp.swapaxes(dense.astype(jnp.float32), 1, 2))                 # (B, 8, C)

    cd = compute_dtype
    u_in = u_col.astype(jnp.float32)   # stays f32: added after f32 accumulation
    i_in = i_t.astype(cd)
    d_in = d_t.astype(cd)

    def col(x):  # bias vectors -> f32 columns (bias add / ReLU run in f32 on the VPU)
        return x.reshape(-1, 1).astype(jnp.float32)

    # bottom layer 1 weight, transposed and feature-padded: (32, 8)
    bw1t = jnp.zeros((DENSE_HID, DENSE_IN_PAD), jnp.float32).at[:, :DENSE_IN].set(
        params["bw1"].T)

    weights = (
        bw1t.astype(cd), col(params["bb1"]),
        tw1_i.T.astype(cd), w_fuse.T.astype(cd),
        params["tw2"].T.astype(cd), col(params["tb2"]),
        params["tw3"].T.astype(cd), col(params["tb3"]),
        params["tw4"].astype(jnp.float32),                 # (64, 1)
        params["tb4"].reshape(1, 1).astype(jnp.float32),   # (1, 1)
    )

    tile_c = C if C <= TILE_C_MAX else TILE_C_MAX
    grid = (B, pl.cdiv(C, tile_c))

    def act_spec(rows):
        return pl.BlockSpec((pl.Squeezed(), rows, tile_c), lambda b, c: (b, 0, c))

    def const_spec(w):
        return pl.BlockSpec(w.shape, lambda b, c: (0, 0))

    in_specs = [
        pl.BlockSpec((pl.Squeezed(), USER_HID[0], 1), lambda b, c: (b, 0, 0)),  # u_col
        act_spec(E),               # i_vec^T
        act_spec(DENSE_IN_PAD),    # dense^T
    ] + [const_spec(w) for w in weights]

    out_specs = pl.BlockSpec((pl.Squeezed(), 1, tile_c), lambda b, c: (b, 0, c))

    # cost hint so XLA schedules the surrounding gathers/transposes sensibly
    n_rows = B * C
    flops_per_row = 2 * (DENSE_IN_PAD * DENSE_HID
                         + 2 * E * USER_HID[0]
                         + USER_HID[0] * USER_HID[1]
                         + USER_HID[1] * USER_HID[2]
                         + USER_HID[2])
    bytes_in = (n_rows * (E + DENSE_IN_PAD) * i_in.dtype.itemsize
                + B * USER_HID[0] * 4
                + sum(int(w.size) * w.dtype.itemsize for w in weights))
    bytes_out = n_rows * 4
    cost = pl.CostEstimate(flops=n_rows * flops_per_row, transcendentals=0,
                           bytes_accessed=bytes_in + bytes_out)

    out = pl.pallas_call(
        _dlrm_mlp_kernel,
        out_shape=jax.ShapeDtypeStruct((B, 1, C), jnp.float32),
        grid=grid,
        in_specs=in_specs,
        out_specs=out_specs,
        compiler_params=pltpu.CompilerParams(
            dimension_semantics=("parallel", "parallel")),
        cost_estimate=cost,
    )(u_in, i_in, d_in, *weights)

    return out.reshape(B, C)                                           # (B, C)


# ------------------------- parameter init (deterministic) -------------------------
def _linear(key, fan_in, fan_out):
    k1, k2 = jax.random.split(key)
    bound = 1.0 / float(fan_in) ** 0.5
    w = jax.random.uniform(k1, (fan_in, fan_out), jnp.float32, -bound, bound)
    b = jax.random.uniform(k2, (fan_out,), jnp.float32, -bound, bound)
    return w, b


def _embedding(key, rows, dim, zero_pad_row0=True):
    t = jax.random.normal(key, (rows, dim), jnp.float32)
    if zero_pad_row0:
        t = t.at[0].set(0.0)   # padding_idx=0
    return t


def init_params(key):
    ks = jax.random.split(key, 16)
    p = {}
    # bottom: Linear(3, 32) -> ReLU -> Linear(32, 32)
    p["bw1"], p["bb1"] = _linear(ks[0], DENSE_IN, DENSE_HID)
    p["bw2"], p["bb2"] = _linear(ks[1], DENSE_HID, EMBED_DIM)
    # top: 64 -> 256 -> 128 -> 64 -> 1
    p["tw1"], p["tb1"] = _linear(ks[2], EMBED_DIM * 2, USER_HID[0])
    p["tw2"], p["tb2"] = _linear(ks[3], USER_HID[0], USER_HID[1])
    p["tw3"], p["tb3"] = _linear(ks[4], USER_HID[1], USER_HID[2])
    p["tw4"], p["tb4"] = _linear(ks[5], USER_HID[2], 1)
    # embedding tables (padding_idx=0)
    p["emb_hist"] = _embedding(ks[6], V_BOOKS, EMBED_DIM)
    p["emb_wish"] = _embedding(ks[7], V_BOOKS, EMBED_DIM)
    p["emb_cand"] = _embedding(ks[8], V_BOOKS, EMBED_DIM)
    p["emb_auth"] = _embedding(ks[9], NUM_AUTH + 1, EMBED_DIM)
    p["emb_lang"] = _embedding(ks[10], NUM_LANG + 1, EMBED_DIM)
    p["emb_tags"] = _embedding(ks[11], NUM_TAGS, EMBED_DIM)
    return p


# ------------------------- pure-JAX reference (for verification) -------------------------
def dlrm_reference(params, hist, wish, cand, auth, lang, tags, dense):
    B, C = cand.shape
    u_h = jnp.take(params["emb_hist"], hist, axis=0).mean(axis=1)
    u_w = jnp.take(params["emb_wish"], wish, axis=0).mean(axis=1)
    u_vec = u_h + u_w
    e_c = jnp.take(params["emb_cand"], cand, axis=0)
    e_a = jnp.take(params["emb_auth"], auth, axis=0)
    e_l = jnp.take(params["emb_lang"], lang, axis=0)
    e_t = jnp.take(params["emb_tags"], tags, axis=0).sum(axis=2) / 5.0
    i_vec = e_c + e_a + e_l + e_t
    d = dense.reshape(-1, DENSE_IN)
    h = jnp.maximum(d @ params["bw1"] + params["bb1"], 0.0)
    d_vec = (h @ params["bw2"] + params["bb2"]).reshape(B, C, EMBED_DIM)
    i_final = i_vec + d_vec
    u_exp = jnp.broadcast_to(u_vec[:, None, :], (B, C, EMBED_DIM))
    x = jnp.concatenate([u_exp, i_final], axis=2)
    h = jnp.maximum(x @ params["tw1"] + params["tb1"], 0.0)
    h = jnp.maximum(h @ params["tw2"] + params["tb2"], 0.0)
    h = jnp.maximum(h @ params["tw3"] + params["tb3"], 0.0)
    return (h @ params["tw4"] + params["tb4"]).squeeze(2)


if __name__ == "__main__":
    key = jax.random.PRNGKey(0)
    k_param, k_h, k_w, k_c, k_a, k_l, k_t, k_d = jax.random.split(key, 8)

    params = init_params(k_param)

    B, C = 2, 8
    HIST_LEN, WISH_LEN, N_TAGS_PER = 6, 5, 5

    hist = jax.random.randint(k_h, (B, HIST_LEN), 0, V_BOOKS, dtype=jnp.int32)
    wish = jax.random.randint(k_w, (B, WISH_LEN), 0, V_BOOKS, dtype=jnp.int32)
    cand = jax.random.randint(k_c, (B, C), 0, V_BOOKS, dtype=jnp.int32)
    auth = jax.random.randint(k_a, (B, C), 0, NUM_AUTH + 1, dtype=jnp.int32)
    lang = jax.random.randint(k_l, (B, C), 0, NUM_LANG + 1, dtype=jnp.int32)
    tags = jax.random.randint(k_t, (B, C, N_TAGS_PER), 0, NUM_TAGS, dtype=jnp.int32)
    dense = jax.random.normal(k_d, (B, C, DENSE_IN), jnp.float32)

    ref = dlrm_reference(params, hist, wish, cand, auth, lang, tags, dense)

    # exact-math check of the fused kernel (f32 data path)
    scores_f32 = dlrm_forward(params, hist, wish, cand, auth, lang, tags, dense,
                              compute_dtype=jnp.float32)
    scores_f32 = jax.block_until_ready(scores_f32)
    assert scores_f32.shape == (B, C), scores_f32.shape
    assert jnp.allclose(scores_f32, ref, rtol=1e-4, atol=1e-4), (
        f"f32 max abs err = {jnp.max(jnp.abs(scores_f32 - ref))}")

    # bf16 data path (production config): looser tolerance for bf16 rounding
    scores = dlrm_forward(params, hist, wish, cand, auth, lang, tags, dense,
                          compute_dtype=jnp.bfloat16)
    scores = jax.block_until_ready(scores)
    assert scores.shape == (B, C), scores.shape
    err = float(jnp.max(jnp.abs(scores - ref)))
    assert err < 5e-2, f"bf16 max abs err = {err}"

    print("KERNEL_OK")
</pallas_src>

<mosaic_0001>
module attributes {stable_mosaic.version = 11 : i64} {
  func.func @_dlrm_mlp_kernel(%arg0: i32, %arg1: i32, %arg2: memref<1x256x1xf32, #tpu.memory_space<vmem>>, %arg3: memref<1x32x8xf32, #tpu.memory_space<vmem>>, %arg4: memref<1x8x8xf32, #tpu.memory_space<vmem>>, %arg5: memref<32x8xf32, #tpu.memory_space<vmem>>, %arg6: memref<32x1xf32, #tpu.memory_space<vmem>>, %arg7: memref<256x32xf32, #tpu.memory_space<vmem>>, %arg8: memref<256x32xf32, #tpu.memory_space<vmem>>, %arg9: memref<128x256xf32, #tpu.memory_space<vmem>>, %arg10: memref<128x1xf32, #tpu.memory_space<vmem>>, %arg11: memref<64x128xf32, #tpu.memory_space<vmem>>, %arg12: memref<64x1xf32, #tpu.memory_space<vmem>>, %arg13: memref<64x1xf32, #tpu.memory_space<vmem>>, %arg14: memref<1x1xf32, #tpu.memory_space<vmem>>, %arg15: memref<1x1x8xf32, #tpu.memory_space<vmem>>) attributes {dimension_semantics = [#tpu.dimension_semantics<parallel>, #tpu.dimension_semantics<parallel>], iteration_bounds = array<i64: 2, 1>, scalar_prefetch = 0 : i64, scratch_operands = 0 : i64, tpu.core_type = #tpu.core_type<tc>, window_params = [{transform_indices = @transform_0, window_bounds = array<i64: 1, 256, 1>}, {transform_indices = @transform_1, window_bounds = array<i64: 1, 32, 8>}, {transform_indices = @transform_2, window_bounds = array<i64: 1, 8, 8>}, {pipeline_mode = #tpu.pipeline_mode<synchronous>, transform_indices = @transform_3, window_bounds = array<i64: 32, 8>}, {pipeline_mode = #tpu.pipeline_mode<synchronous>, transform_indices = @transform_4, window_bounds = array<i64: 32, 1>}, {pipeline_mode = #tpu.pipeline_mode<synchronous>, transform_indices = @transform_5, window_bounds = array<i64: 256, 32>}, {pipeline_mode = #tpu.pipeline_mode<synchronous>, transform_indices = @transform_6, window_bounds = array<i64: 256, 32>}, {pipeline_mode = #tpu.pipeline_mode<synchronous>, transform_indices = @transform_7, window_bounds = array<i64: 128, 256>}, {pipeline_mode = #tpu.pipeline_mode<synchronous>, transform_indices = @transform_8, window_bounds = array<i64: 128, 1>}, {pipeline_mode = #tpu.pipeline_mode<synchronous>, transform_indices = @transform_9, window_bounds = array<i64: 64, 128>}, {pipeline_mode = #tpu.pipeline_mode<synchronous>, transform_indices = @transform_10, window_bounds = array<i64: 64, 1>}, {pipeline_mode = #tpu.pipeline_mode<synchronous>, transform_indices = @transform_11, window_bounds = array<i64: 64, 1>}, {pipeline_mode = #tpu.pipeline_mode<synchronous>, transform_indices = @transform_12, window_bounds = array<i64: 1, 1>}, {transform_indices = @transform_13, window_bounds = array<i64: 1, 1, 8>}]} {
    %c0 = arith.constant 0 : index
    %c0_0 = arith.constant 0 : index
    %0 = vector.load %arg5[%c0, %c0_0] : memref<32x8xf32, #tpu.memory_space<vmem>>, vector<32x8xf32>
    %c0_1 = arith.constant 0 : index
    %c0_2 = arith.constant 0 : index
    %c0_3 = arith.constant 0 : index
    %1 = vector.load %arg4[%c0_1, %c0_2, %c0_3] : memref<1x8x8xf32, #tpu.memory_space<vmem>>, vector<1x8x8xf32>
    %2 = vector.shape_cast %1 : vector<1x8x8xf32> to vector<8x8xf32>
    %cst = arith.constant dense<0.000000e+00> : vector<32x8xf32>
    %3 = tpu.matmul %0, %2, %cst {dimension_numbers = #tpu.dot_dimension_numbers<[1], [0], [0], [1], [0, 0, 1, 1], [], []>} : vector<32x8xf32>, vector<8x8xf32>, vector<32x8xf32> -> vector<32x8xf32>
    %c0_4 = arith.constant 0 : index
    %c0_5 = arith.constant 0 : index
    %4 = vector.load %arg6[%c0_4, %c0_5] : memref<32x1xf32, #tpu.memory_space<vmem>>, vector<32x1xf32>
    %5 = vector.broadcast %4 : vector<32x1xf32> to vector<32x8xf32>
    %6 = arith.addf %3, %5 : vector<32x8xf32>
    %cst_6 = arith.constant 0.000000e+00 : f32
    %7 = vector.broadcast %cst_6 : f32 to vector<32x8xf32>
    %8 = arith.maximumf %6, %7 : vector<32x8xf32>
    %c0_7 = arith.constant 0 : index
    %c0_8 = arith.constant 0 : index
    %c0_9 = arith.constant 0 : index
    %9 = vector.load %arg2[%c0_7, %c0_8, %c0_9] : memref<1x256x1xf32, #tpu.memory_space<vmem>>, vector<1x256x1xf32>
    %10 = vector.shape_cast %9 : vector<1x256x1xf32> to vector<256x1xf32>
    %c0_10 = arith.constant 0 : index
    %c0_11 = arith.constant 0 : index
    %11 = vector.load %arg7[%c0_10, %c0_11] : memref<256x32xf32, #tpu.memory_space<vmem>>, vector<256x32xf32>
    %c0_12 = arith.constant 0 : index
    %c0_13 = arith.constant 0 : index
    %c0_14 = arith.constant 0 : index
    %12 = vector.load %arg3[%c0_12, %c0_13, %c0_14] : memref<1x32x8xf32, #tpu.memory_space<vmem>>, vector<1x32x8xf32>
    %13 = vector.shape_cast %12 : vector<1x32x8xf32> to vector<32x8xf32>
    %cst_15 = arith.constant dense<0.000000e+00> : vector<256x8xf32>
    %14 = tpu.matmul %11, %13, %cst_15 {dimension_numbers = #tpu.dot_dimension_numbers<[1], [0], [0], [1], [0, 0, 1, 1], [], []>} : vector<256x32xf32>, vector<32x8xf32>, vector<256x8xf32> -> vector<256x8xf32>
    %15 = vector.broadcast %10 : vector<256x1xf32> to vector<256x8xf32>
    %16 = arith.addf %15, %14 : vector<256x8xf32>
    %c0_16 = arith.constant 0 : index
    %c0_17 = arith.constant 0 : index
    %17 = vector.load %arg8[%c0_16, %c0_17] : memref<256x32xf32, #tpu.memory_space<vmem>>, vector<256x32xf32>
    %cst_18 = arith.constant dense<0.000000e+00> : vector<256x8xf32>
    %18 = tpu.matmul %17, %8, %cst_18 {dimension_numbers = #tpu.dot_dimension_numbers<[1], [0], [0], [1], [0, 0, 1, 1], [], []>} : vector<256x32xf32>, vector<32x8xf32>, vector<256x8xf32> -> vector<256x8xf32>
    %19 = arith.addf %16, %18 : vector<256x8xf32>
    %cst_19 = arith.constant 0.000000e+00 : f32
    %20 = vector.broadcast %cst_19 : f32 to vector<256x8xf32>
    %21 = arith.maximumf %19, %20 : vector<256x8xf32>
    %c0_20 = arith.constant 0 : index
    %c0_21 = arith.constant 0 : index
    %22 = vector.load %arg9[%c0_20, %c0_21] : memref<128x256xf32, #tpu.memory_space<vmem>>, vector<128x256xf32>
    %cst_22 = arith.constant dense<0.000000e+00> : vector<128x8xf32>
    %23 = tpu.matmul %22, %21, %cst_22 {dimension_numbers = #tpu.dot_dimension_numbers<[1], [0], [0], [1], [0, 0, 1, 1], [], []>} : vector<128x256xf32>, vector<256x8xf32>, vector<128x8xf32> -> vector<128x8xf32>
    %c0_23 = arith.constant 0 : index
    %c0_24 = arith.constant 0 : index
    %24 = vector.load %arg10[%c0_23, %c0_24] : memref<128x1xf32, #tpu.memory_space<vmem>>, vector<128x1xf32>
    %25 = vector.broadcast %24 : vector<128x1xf32> to vector<128x8xf32>
    %26 = arith.addf %23, %25 : vector<128x8xf32>
    %cst_25 = arith.constant 0.000000e+00 : f32
    %27 = vector.broadcast %cst_25 : f32 to vector<128x8xf32>
    %28 = arith.maximumf %26, %27 : vector<128x8xf32>
    %c0_26 = arith.constant 0 : index
    %c0_27 = arith.constant 0 : index
    %29 = vector.load %arg11[%c0_26, %c0_27] : memref<64x128xf32, #tpu.memory_space<vmem>>, vector<64x128xf32>
    %cst_28 = arith.constant dense<0.000000e+00> : vector<64x8xf32>
    %30 = tpu.matmul %29, %28, %cst_28 {dimension_numbers = #tpu.dot_dimension_numbers<[1], [0], [0], [1], [0, 0, 1, 1], [], []>} : vector<64x128xf32>, vector<128x8xf32>, vector<64x8xf32> -> vector<64x8xf32>
    %c0_29 = arith.constant 0 : index
    %c0_30 = arith.constant 0 : index
    %31 = vector.load %arg12[%c0_29, %c0_30] : memref<64x1xf32, #tpu.memory_space<vmem>>, vector<64x1xf32>
    %32 = vector.broadcast %31 : vector<64x1xf32> to vector<64x8xf32>
    %33 = arith.addf %30, %32 : vector<64x8xf32>
    %cst_31 = arith.constant 0.000000e+00 : f32
    %34 = vector.broadcast %cst_31 : f32 to vector<64x8xf32>
    %35 = arith.maximumf %33, %34 : vector<64x8xf32>
    %c0_32 = arith.constant 0 : index
    %c0_33 = arith.constant 0 : index
    %36 = vector.load %arg13[%c0_32, %c0_33] : memref<64x1xf32, #tpu.memory_space<vmem>>, vector<64x1xf32>
    %37 = vector.broadcast %36 : vector<64x1xf32> to vector<64x8xf32>
    %38 = arith.mulf %35, %37 : vector<64x8xf32>
    %cst_34 = arith.constant dense<0.000000e+00> : vector<8xf32>
    %39 = vector.multi_reduction <add>, %38, %cst_34 [0] : vector<64x8xf32> to vector<8xf32>
    %40 = vector.shape_cast %39 : vector<8xf32> to vector<1x8xf32>
    %c0_35 = arith.constant 0 : index
    %c0_36 = arith.constant 0 : index
    %41 = vector.load %arg14[%c0_35, %c0_36] : memref<1x1xf32, #tpu.memory_space<vmem>>, vector<1x1xf32>
    %42 = vector.broadcast %41 : vector<1x1xf32> to vector<1x8xf32>
    %43 = arith.addf %40, %42 : vector<1x8xf32>
    %c0_37 = arith.constant 0 : index
    %c0_38 = arith.constant 0 : index
    %c0_39 = arith.constant 0 : index
    %44 = vector.load %arg15[%c0_37, %c0_38, %c0_39] : memref<1x1x8xf32, #tpu.memory_space<vmem>>, vector<1x1x8xf32>
    %45 = vector.shape_cast %44 : vector<1x1x8xf32> to vector<1x8xf32>
    %46 = vector.shape_cast %43 : vector<1x8xf32> to vector<1x1x8xf32>
    tpu.vector_store %arg15[%c0_37, %c0_38, %c0_39], %46 {strides = array<i32>} : memref<1x1x8xf32, #tpu.memory_space<vmem>>, vector<1x1x8xf32>,
    return
  }
  func.func @transform_0(%arg0: i32, %arg1: i32) -> (i32, i32, i32) {
    %c0_i32 = arith.constant 0 : i32
    %c0_i32_0 = arith.constant 0 : i32
    %c0_i32_1 = arith.constant 0 : i32
    return %arg0, %c0_i32, %c0_i32_0 : i32, i32, i32
  }
  func.func @transform_1(%arg0: i32, %arg1: i32) -> (i32, i32, i32) {
    %c0_i32 = arith.constant 0 : i32
    %c0_i32_0 = arith.constant 0 : i32
    return %arg0, %c0_i32, %arg1 : i32, i32, i32
  }
  func.func @transform_2(%arg0: i32, %arg1: i32) -> (i32, i32, i32) {
    %c0_i32 = arith.constant 0 : i32
    %c0_i32_0 = arith.constant 0 : i32
    return %arg0, %c0_i32, %arg1 : i32, i32, i32
  }
  func.func @transform_3(%arg0: i32, %arg1: i32) -> (i32, i32) {
    %c0_i32 = arith.constant 0 : i32
    %c0_i32_0 = arith.constant 0 : i32
    %c0_i32_1 = arith.constant 0 : i32
    return %c0_i32, %c0_i32_0 : i32, i32
  }
  func.func @transform_4(%arg0: i32, %arg1: i32) -> (i32, i32) {
    %c0_i32 = arith.constant 0 : i32
    %c0_i32_0 = arith.constant 0 : i32
    %c0_i32_1 = arith.constant 0 : i32
    return %c0_i32, %c0_i32_0 : i32, i32
  }
  func.func @transform_5(%arg0: i32, %arg1: i32) -> (i32, i32) {
    %c0_i32 = arith.constant 0 : i32
    %c0_i32_0 = arith.constant 0 : i32
    %c0_i32_1 = arith.constant 0 : i32
    return %c0_i32, %c0_i32_0 : i32, i32
  }
  func.func @transform_6(%arg0: i32, %arg1: i32) -> (i32, i32) {
    %c0_i32 = arith.constant 0 : i32
    %c0_i32_0 = arith.constant 0 : i32
    %c0_i32_1 = arith.constant 0 : i32
    return %c0_i32, %c0_i32_0 : i32, i32
  }
  func.func @transform_7(%arg0: i32, %arg1: i32) -> (i32, i32) {
    %c0_i32 = arith.constant 0 : i32
    %c0_i32_0 = arith.constant 0 : i32
    %c0_i32_1 = arith.constant 0 : i32
    return %c0_i32, %c0_i32_0 : i32, i32
  }
  func.func @transform_8(%arg0: i32, %arg1: i32) -> (i32, i32) {
    %c0_i32 = arith.constant 0 : i32
    %c0_i32_0 = arith.constant 0 : i32
    %c0_i32_1 = arith.constant 0 : i32
    return %c0_i32, %c0_i32_0 : i32, i32
  }
  func.func @transform_9(%arg0: i32, %arg1: i32) -> (i32, i32) {
    %c0_i32 = arith.constant 0 : i32
    %c0_i32_0 = arith.constant 0 : i32
    %c0_i32_1 = arith.constant 0 : i32
    return %c0_i32, %c0_i32_0 : i32, i32
  }
  func.func @transform_10(%arg0: i32, %arg1: i32) -> (i32, i32) {
    %c0_i32 = arith.constant 0 : i32
    %c0_i32_0 = arith.constant 0 : i32
    %c0_i32_1 = arith.constant 0 : i32
    return %c0_i32, %c0_i32_0 : i32, i32
  }
  func.func @transform_11(%arg0: i32, %arg1: i32) -> (i32, i32) {
    %c0_i32 = arith.constant 0 : i32
    %c0_i32_0 = arith.constant 0 : i32
    %c0_i32_1 = arith.constant 0 : i32
    return %c0_i32, %c0_i32_0 : i32, i32
  }
  func.func @transform_12(%arg0: i32, %arg1: i32) -> (i32, i32) {
    %c0_i32 = arith.constant 0 : i32
    %c0_i32_0 = arith.constant 0 : i32
    %c0_i32_1 = arith.constant 0 : i32
    return %c0_i32, %c0_i32_0 : i32, i32
  }
  func.func @transform_13(%arg0: i32, %arg1: i32) -> (i32, i32, i32) {
    %c0_i32 = arith.constant 0 : i32
    %c0_i32_0 = arith.constant 0 : i32
    return %arg0, %c0_i32, %arg1 : i32, i32, i32
  }
}

</mosaic_0001>

<bundles_post_ra>
// kernel: tpu_custom_call.1
= control target key start
LH: loop header
LB: loop body
LE: loop exit
PB: predicated region body
PF: predicated region fallthrough
CT: control target
= control target key end

     0   :  { %s3824_s0 = inlined_call_operand.vmem [shape: f32[2,256,1], index: 0, kind: input, shape index: {}]   ;;  %s3825_s1 = inlined_call_operand.vmem [shape: f32[2,32,8], index: 1, kind: input, shape index: {}]   ;;  %s3826_s2 = inlined_call_operand.vmem [shape: f32[2,8,8], index: 2, kind: input, shape index: {}]   ;;  %s3827_s3 = inlined_call_operand.vmem [shape: f32[32,8], index: 3, kind: input, shape index: {}]   ;;  %s3828_s4 = inlined_call_operand.vmem [shape: f32[32,1], index: 4, kind: input, shape index: {}]   ;;  %s3829_s5 = inlined_call_operand.vmem [shape: f32[256,32], index: 5, kind: input, shape index: {}]   ;;  %s3830_s6 = inlined_call_operand.vmem [shape: f32[256,32], index: 6, kind: input, shape index: {}]   ;;  %s3831_s7 = inlined_call_operand.vmem [shape: f32[128,256], index: 7, kind: input, shape index: {}]   ;;  %s3832_s8 = inlined_call_operand.vmem [shape: f32[128,1], index: 8, kind: input, shape index: {}]   ;;  %s3833_s9 = inlined_call_operand.vmem [shape: f32[64,128], index: 9, kind: input, shape index: {}]   ;;  %s3834_s10 = inlined_call_operand.vmem [shape: f32[64,1], index: 10, kind: input, shape index: {}]   ;;  %s3835_s11 = inlined_call_operand.vmem [shape: f32[64,1], index: 11, kind: input, shape index: {}]   ;;  %s3836_s12 = inlined_call_operand.<no memory space> [shape: f32[1,1], index: 12, kind: input, shape index: {}]   ;;  %s3837_s13 = inlined_call_operand.hbm [shape: f32[2,1,8], index: 13, kind: output, shape index: {}]  }
   0x1   :  { %v18_v0 = vstv %s3836_s12 }
   0x2   :  { %19 = vst [vmem:[#allocation2] sm:$0x1] %v18_v0 }
   0x3   :  { %20 = vsyncpa [#allocation4], 0 }
   0x4   :  { %22 = vsyncpa [#allocation4 + $0x1], 0  ;;  %s3087_s27 = smov 0   ;;  %s3089_s28 = smov 0  }
   0x5   :  { %s3091_s29 = smov 0   ;;  %s3093_s30 = smov 0  }
   0x6   :  { %s3095_s14 = smov 0   ;;  %s3097_s15 = smov 0  }
   0x7 LB: > { %3841 = sst [smem:[#allocation6_spill]] %s2998_s29  ;;  %s2302_s12 = sadd.s32 4294967295, %s3010_s15   ;;  %s3010_s15 = sphi %s3097_s15, %s28_s15   ;;  %s3006_s14 = sphi %s3095_s14, %s3850_s14   ;;  %s3002_s30 = sphi %s3093_s30, %s3849_s30   ;;  %s2998_s29 = sphi %s3091_s29, %s3848_s29   ;;  %s2994_s28 = sphi %s3089_s28, %s3852_s28   ;;  %s2990_s27 = sphi %s3087_s27, %s3851_s27  }
   0x8   : > { %3842 = sst [smem:[#allocation7_spill]] %s3006_s14  ;;  %s2303_s16 = sadd.s32 4294967294, %s3010_s15  }
   0x9   : > { %s40_s17 = sadd.s32 1, %s3006_s14  ;;  %s341_s18 = sadd.s32 1, %s2998_s29 }
   0xa   : > { %p42_p0 = scmp.ge.s32.totalorder %s40_s17, 2  ;;  %p351_p1 = scmp.ne.s32.totalorder %s2998_s29, %s2994_s28 }
   0xb   : > { %p352_p2 = scmp.eq.s32.totalorder %s2302_s12, 1  ;;  %p357_p3 = scmp.ne.s32.totalorder %s2994_s28, %s2990_s27 }
   0xc   : > { %s3854_s17 = smov (%p42_p0, %s40_s17), 0  ;;  %p358_p5 = scmp.eq.s32.totalorder %s2303_s16, 1 }
   0xd   : > { %3843 = sst [smem:[#allocation8_spill]] %s3854_s17  ;;  %p3127_p4 = por %p352_p2, %p351_p1 }
   0xe   : > { %s336_s20 = ssub.s32 %s3006_s14, %s3854_s17  ;;  %p2306_p6 = scmp.ge.s32.totalorder %s3010_s15, 1 }
   0xf   : > { %p339_p7 = scmp.eq.s32.totalorder %s336_s20, 0  ;;  %p3134_p8 = por %p358_p5, %p357_p3 }
  0x10   : > { %p435_p9 = scmp.lt.s32.totalorder %s3010_s15, 3 }
  0x11   : > { %s3140_s22 = scalar_select %p339_p7, %s2998_s29, %s341_s18  }
  0x12   : > { %p436_p10 = pnand %p2306_p6, %p435_p9 }
  0x13   : > { %3846 = sst [smem:[#allocation9_spill]] %s3140_s22  ;;  %v520_v1 = vld [vmem:[%s3828_s4 + $0x10] sm:$0xff] (!%p436_p10)  ;;  %v518_v2 = vld [vmem:[%s3828_s4] sm:$0xff] (!%p436_p10)  ;;  %p493_p11 = scmp.lt.s32.totalorder (!%p436_p10), %s3002_s30, 1  ;;  %vm542_vm0 = vcmask (!%p436_p10), 64512   ;;  %v3012_v3 = vmov (!%p436_p10), 0  }
  0x14   : > { %439 = sbr.rel (%p436_p10) target bundleno = 1093 (0x445), region = 72  ;;  %2931 = vset.pattern.permute.xlu1 (!%p436_p10), %v3012_v3  ;;  %2930 = vset.pattern.permute.xlu0 (!%p436_p10), %v3012_v3  ;;  %v513_v4 = vld [vmem:[%s3827_s3] sm:$0xff] (!%p436_p10)  ;;  %v521_v5 = vld [vmem:[%s3828_s4 + $0x18] sm:$0xff] (!%p436_p10)  ;;  %v519_v6 = vld [vmem:[%s3828_s4 + $0x8] sm:$0xff] (!%p436_p10)  ;;  %vm712_vm1 = vcmask (!%p436_p10), 261120   ;;  %vm2189_vm2 = vcmask (!%p436_p10), 57344  }
  0x15   : > { %534 = vperm.xlu1 (!%p436_p10), %2931, %v520_v1   ;;  %524 = vperm.xlu0 (!%p436_p10), %2930, %v518_v2   ;;  %v514_v8 = vld [vmem:[%s3827_s3 + $0x8] sm:$0xff] (!%p436_p10)  ;;  %v515_v11 = vld [vmem:[%s3827_s3 + $0x10] sm:$0xff] (!%p436_p10)  ;;  %v516_v12 = vld [vmem:[%s3827_s3 + $0x18] sm:$0xff] (!%p436_p10) }
  0x16   : > { %2568 = vmatprep.mubr.msk.f32.mxu0 (!%p436_p10), %vm542_vm0, %v513_v4  ;;  %v676_v35 = vld [vmem:[%s3829_s5] sm:$0xff] (!%p436_p10)  ;;  %v677_v36 = vld [vmem:[%s3829_s5 + $0x8] sm:$0xff] (!%p436_p10)  ;;  %v678_v39 = vld [vmem:[%s3829_s5 + $0x10] sm:$0xff] (!%p436_p10) }
  0x17   : > { %2582 = vmatprep.mubr.msk.f32.mxu1 (!%p436_p10), %vm712_vm1, %v676_v35  ;;  %v679_v40 = vld [vmem:[%s3829_s5 + $0x18] sm:$0xff] (!%p436_p10)  ;;  %v680_v43 = vld [vmem:[%s3829_s5 + $0x20] sm:$0xff] (!%p436_p10)  ;;  %v681_v44 = vld [vmem:[%s3829_s5 + $0x28] sm:$0xff] (!%p436_p10) }
  0x18   : > { %v682_v47 = vld [vmem:[%s3829_s5 + $0x30] sm:$0xff] (!%p436_p10)  ;;  %v683_v48 = vld [vmem:[%s3829_s5 + $0x38] sm:$0xff] (!%p436_p10)  ;;  %v684_v51 = vld [vmem:[%s3829_s5 + $0x40] sm:$0xff] (!%p436_p10) }
  0x19   : > { %539 = vperm.xlu1 (!%p436_p10), %2931, %v521_v5   ;;  %529 = vperm.xlu0 (!%p436_p10), %2930, %v519_v6   ;;  %v685_v52 = vld [vmem:[%s3829_s5 + $0x48] sm:$0xff] (!%p436_p10)  ;;  %v686_v55 = vld [vmem:[%s3829_s5 + $0x50] sm:$0xff] (!%p436_p10)  ;;  %v687_v56 = vld [vmem:[%s3829_s5 + $0x58] sm:$0xff] (!%p436_p10) }
  0x1a   : > { %v688_v59 = vld [vmem:[%s3829_s5 + $0x60] sm:$0xff] (!%p436_p10)  ;;  %v689_v60 = vld [vmem:[%s3829_s5 + $0x68] sm:$0xff] (!%p436_p10)  ;;  %v690_v63 = vld [vmem:[%s3829_s5 + $0x70] sm:$0xff] (!%p436_p10) }
  0x1b   : > { %s3153_s18 = scalar_select %p493_p11, %s3002_s30, 1  ;;  %v691_v0 = vld [vmem:[%s3829_s5 + $0x78] sm:$0xff]  ;;  %v1676_v1 = vld [vmem:[%s3832_s8 + $0x8] sm:$0xff]  ;;  %v1675_v2 = vld [vmem:[%s3832_s8] sm:$0xff] }
  0x1c   : > { %v692_v3 = vld [vmem:[%s3829_s5 + $0x80] sm:$0xff]  ;;  %v693_v4 = vld [vmem:[%s3829_s5 + $0x88] sm:$0xff]  ;;  %v1678_v5 = vld [vmem:[%s3832_s8 + $0x18] sm:$0xff] }
  0x1d   : > { %s2383_s26 = sshll.u32 %s3153_s18, 8  ;;  %s2311_s17 = sshll.u32 %s3153_s18, 3  ;;  %v1677_v6 = vld [vmem:[%s3832_s8 + $0x10] sm:$0xff]  ;;  %v1226_v35 = vld [vmem:[%s3830_s6] sm:$0xff] }
  0x1e   : > { %s3167_s14 = scalar_lea.vmem %s3824_s0, %s2383_s26  ;;  %s512_s20 = scalar_lea.vmem %s3826_s2, %s2311_s17 }
  0x1f   : > { %v517_v7 = vld [vmem:[%s512_s20] sm:$0xff]  ;;  %v661_v9 = vld [vmem:[%s3167_s14 + $0x88] sm:$0xff]  ;;  %v663_v15 = vld [vmem:[%s3167_s14 + $0x98] sm:$0xff]  ;;  %s2384_s26 = sshll.u32 %s3153_s18, 5  ;;  %s2380_s18 = sshll.u32 %s3002_s30, 4 }
  0x20   : > { %2566 = vmatprep.subr.mxu0 %v517_v7  ;;  %v660_v10 = vld [vmem:[%s3167_s14 + $0x80] sm:$0xff]  ;;  %1121 = vperm.xlu1 %2931, %v661_v9   ;;  %v645_v13 = vld [vmem:[%s3167_s14 + $0x8] sm:$0xff]  ;;  %v662_v16 = vld [vmem:[%s3167_s14 + $0x90] sm:$0xff]  ;;  %s505_s20 = scalar_lea.vmem %s3825_s1, %s2384_s26  ;;  %s3777_s29 = scalar_lea.hbm %s3837_s13, %s2380_s18 }
  0x21   : > { %2567 = vmatpush3.msra.mxu0 %v517_v7  ;;  %1116 = vperm.xlu0 %2930, %v660_v10   ;;  %v644_v14 = vld [vmem:[%s3167_s14] sm:$0xff]  ;;  %v647_v17 = vld [vmem:[%s3167_s14 + $0x18] sm:$0xff]  ;;  %v646_v18 = vld [vmem:[%s3167_s14 + $0x10] sm:$0xff]  ;;  %s3013_s30 = smov [#allocation3]  }
  0x22   : > { %2569 = vmatmul.mubr.msk.f32.vlgmr.msra.gmra.mrb[0].mxu0 %vm542_vm0, %v514_v8  ;;  %v665_v19 = vld [vmem:[%s3167_s14 + $0xa8] sm:$0xff]  ;;  %v664_v20 = vld [vmem:[%s3167_s14 + $0xa0] sm:$0xff]  ;;  %v667_v23 = vld [vmem:[%s3167_s14 + $0xb8] sm:$0xff]  ;;  %s2936_s26 = sshll.u32 %s3013_s30, 4  ;;  %s2937_s26 = int_to_ptr.vmem [resolvable:$false] %s2936_s26 }
  0x23   : > { %2571 = vmatprep.mubr.msk.f32.mxu0 %vm542_vm0, %v515_v11  ;;  %v649_v21 = vld [vmem:[%s3167_s14 + $0x28] sm:$0xff]  ;;  %v648_v22 = vld [vmem:[%s3167_s14 + $0x20] sm:$0xff]  ;;  %v666_v24 = vld [vmem:[%s3167_s14 + $0xb0] sm:$0xff]  ;;  %s2938_s12 = scalar_lea.vmem %s2937_s26, 32 }
  0x24   : > { %1041 = vperm.xlu1 %2931, %v645_v13   ;;  %v708_v25 = vld [vmem:[%s505_s20] sm:$0xff]  ;;  %v709_v26 = vld [vmem:[%s505_s20 + $0x8] sm:$0xff]  ;;  %v651_v28 = vld [vmem:[%s3167_s14 + $0x38] sm:$0xff] }
  0x25   : > { %1036 = vperm.xlu0 %2930, %v644_v14   ;;  %v2730_v27 = vpack.c.bf16 %v709_v26, %v708_v25  ;;  %v650_v29 = vld [vmem:[%s3167_s14 + $0x30] sm:$0xff]  ;;  %v711_v31 = vld [vmem:[%s505_s20 + $0x18] sm:$0xff]  ;;  %v669_v33 = vld [vmem:[%s3167_s14 + $0xc8] sm:$0xff] }
  0x26   : > { %2572 = vmatmul.mubr.msk.f32.gmra.mrb[2].mxu0 %vm542_vm0, %v516_v12  ;;  %v710_v30 = vld [vmem:[%s505_s20 + $0x10] sm:$0xff]  ;;  %v668_v34 = vld [vmem:[%s3167_s14 + $0xc0] sm:$0xff]  ;;  %v653_v37 = vld [vmem:[%s3167_s14 + $0x48] sm:$0xff]  ;;  %s491_s20 = sand.u32 1, %s2994_s28  }
  0x27   : > { %2731 = vmatprep.subr.bf16.mxu1 %v2730_v27  ;;  %v2734_v32 = vpack.c.bf16 %v711_v31, %v710_v30  ;;  %v652_v38 = vld [vmem:[%s3167_s14 + $0x40] sm:$0xff]  ;;  %v671_v41 = vld [vmem:[%s3167_s14 + $0xd8] sm:$0xff]  ;;  %v670_v42 = vld [vmem:[%s3167_s14 + $0xd0] sm:$0xff]  ;;  %s492_s23 = scalar_lea.vmem [#allocation3], %s491_s20  ;;  %s2192_s17 = scalar_lea.sflag [#allocation4], %s491_s20 }
  0x28   : > { %1131 = vperm.xlu1 %2931, %v663_v15   ;;  %2733 = vmatpush3.bf16.msra.mxu1 %v2730_v27  ;;  %v655_v45 = vld [vmem:[%s3167_s14 + $0x58] sm:$0xff]  ;;  %v654_v46 = vld [vmem:[%s3167_s14 + $0x50] sm:$0xff]  ;;  %v673_v49 = vld [vmem:[%s3167_s14 + $0xe8] sm:$0xff] }
  0x29   : > { %1126 = vperm.xlu0 %2930, %v662_v16   ;;  %2735 = vmatprep.subr.bf16.mxu1 %v2734_v32  ;;  %v672_v50 = vld [vmem:[%s3167_s14 + $0xe0] sm:$0xff]  ;;  %v657_v53 = vld [vmem:[%s3167_s14 + $0x68] sm:$0xff]  ;;  %v675_v57 = vld [vmem:[%s3167_s14 + $0xf8] sm:$0xff] }
  0x2a   : > { %v656_v54 = vld [vmem:[%s3167_s14 + $0x60] sm:$0xff]  ;;  %v674_v58 = vld [vmem:[%s3167_s14 + $0xf0] sm:$0xff]  ;;  %v659_v61 = vld [vmem:[%s3167_s14 + $0x78] sm:$0xff] }
  0x2b   : > { %v658_v62 = vld [vmem:[%s3167_s14 + $0x70] sm:$0xff]  ;;  %v695_v8 = vld [vmem:[%s3829_s5 + $0x98] sm:$0xff]  ;;  %v1680_v9 = vld [vmem:[%s3832_s8 + $0x28] sm:$0xff]  ;;  %s2205_s14 = sshll.u32 %s492_s23, 4  ;;  %s3779_s14 = int_to_ptr.vmem [resolvable:$true] %s2205_s14 }
  0x2c   : > { %1051 = vperm.xlu1 %2931, %v647_v17   ;;  %2737 = vmatpush3.bf16.msra.mxu1 %v2734_v32  ;;  %v694_v7 = vld [vmem:[%s3829_s5 + $0x90] sm:$0xff]  ;;  %v1679_v10 = vld [vmem:[%s3832_s8 + $0x20] sm:$0xff]  ;;  %v697_v12 = vld [vmem:[%s3829_s5 + $0xa8] sm:$0xff]  ;;  %s2932_s22 = scalar_lea.vmem %s3779_s14, 16  ;;  %p2939_p1 = scmp.lt.s32.totalorder %s3779_s14, %s2937_s26 }
  0x2d   : > { %1046 = vperm.xlu0 %2930, %v646_v18   ;;  %v696_v11 = vld [vmem:[%s3829_s5 + $0xa0] sm:$0xff]  ;;  %v1682_v13 = vld [vmem:[%s3832_s8 + $0x38] sm:$0xff]  ;;  %v1681_v14 = vld [vmem:[%s3832_s8 + $0x30] sm:$0xff]  ;;  %p2933_p12 = scmp.ne.s32.totalorder %s3779_s14, %s2932_s22  ;;  %p2940_p2 = scmp.lt.s32.totalorder %s2938_s12, %s2932_s22 }
  0x2e   : > { %v698_v15 = vld [vmem:[%s3829_s5 + $0xb0] sm:$0xff]  ;;  %v699_v16 = vld [vmem:[%s3829_s5 + $0xb8] sm:$0xff]  ;;  %v1684_v17 = vld [vmem:[%s3832_s8 + $0x48] sm:$0xff] }
  0x2f   : > { %2583 = vmatmul.mubr.msk.f32.vlgmr.msra.gmra.mrb[0].mxu1 %vm712_vm1, %v677_v36  ;;  %v1683_v18 = vld [vmem:[%s3832_s8 + $0x40] sm:$0xff]  ;;  %v702_v25 = vld [vmem:[%s3829_s5 + $0xd0] sm:$0xff]  ;;  %v703_v26 = vld [vmem:[%s3829_s5 + $0xd8] sm:$0xff]  ;;  %p2934_p13 = pnand %p2933_p12, %p3127_p4  ;;  %p2941_p3 = por %p2940_p2, %p2939_p1 }
  0x30   : > { %1141 = vperm.xlu1 %2931, %v665_v19   ;;  %2585 = vmatprep.mubr.msk.f32.mxu1 %vm712_vm1, %v678_v39  ;;  %v700_v19 = vld [vmem:[%s3829_s5 + $0xc0] sm:$0xff]  ;;  %v1690_v27 = vld [vmem:[%s3832_s8 + $0x78] sm:$0xff]  ;;  %v705_v30 = vld [vmem:[%s3829_s5 + $0xe8] sm:$0xff] }
  0x31   : > { %1136 = vperm.xlu0 %2930, %v664_v20   ;;  %v1686_v20 = vld [vmem:[%s3832_s8 + $0x58] sm:$0xff]  ;;  %v706_v31 = vld [vmem:[%s3829_s5 + $0xf0] sm:$0xff]  ;;  %v2101_v39 = vld [vmem:[%s3835_s11] sm:$0xff]  ;;  %p2935_p0 = pneg %p2934_p13 }
  0x32   : > { %v707_v32 = vld [vmem:[%s3829_s5 + $0xf8] sm:$0xff] }
  0x33   : > { %2586 = vmatmul.mubr.msk.f32.gmra.mrb[2].mxu1 %vm712_vm1, %v679_v40  ;;  %v1943_v36 = vld [vmem:[%s3834_s10 + $0x18] sm:$0xff]  ;;  %v2103_v40 = vld [vmem:[%s3835_s11 + $0x10] sm:$0xff]  ;;  %p2942_p5 = pnand %p2941_p3, %p2935_p0 }
  0x34   : > { %1061 = vperm.xlu1 %2931, %v649_v21   ;;  %2588 = vmatprep.mubr.msk.f32.mxu1 %vm712_vm1, %v680_v43  ;;  %v1685_v21 = vld [vmem:[%s3832_s8 + $0x50] sm:$0xff]  ;;  %v1945_v43 = vld [vmem:[%s3834_s10 + $0x28] sm:$0xff] }
  0x35   : > { %1056 = vperm.xlu0 %2930, %v648_v22   ;;  %v701_v22 = vld [vmem:[%s3829_s5 + $0xc8] sm:$0xff] }
  0x37   : > { %2589 = vmatmul.mubr.msk.f32.gmra.mrb[4].mxu1 %vm712_vm1, %v681_v44  ;;  %v2105_v44 = vld [vmem:[%s3835_s11 + $0x20] sm:$0xff] }
  0x38   : > { %1151 = vperm.xlu1 %2931, %v667_v23   ;;  %2591 = vmatprep.mubr.msk.f32.mxu1 %vm712_vm1, %v682_v47  ;;  %v1688_v23 = vld [vmem:[%s3832_s8 + $0x68] sm:$0xff]  ;;  %v1947_v47 = vld [vmem:[%s3834_s10 + $0x38] sm:$0xff] }
  0x39   : > { %1146 = vperm.xlu0 %2930, %v666_v24   ;;  %v1687_v24 = vld [vmem:[%s3832_s8 + $0x60] sm:$0xff] }
  0x3b   : > { %2592 = vmatmul.mubr.msk.f32.gmra.mrb[6].mxu1 %vm712_vm1, %v683_v48  ;;  %v2108_v48 = vld [vmem:[%s3835_s11 + $0x38] sm:$0xff] }
  0x3c   : > { %1071 = vperm.xlu1 %2931, %v651_v28   ;;  %2594 = vmatprep.mubr.msk.f32.mxu1 %vm712_vm1, %v684_v51  ;;  %v1689_v28 = vld [vmem:[%s3832_s8 + $0x70] sm:$0xff] }
  0x3d   : > { %1066 = vperm.xlu0 %2930, %v650_v29   ;;  %v704_v29 = vld [vmem:[%s3829_s5 + $0xe0] sm:$0xff] }
  0x3f   : > { %2595 = vmatmul.mubr.msk.f32.gmra.mrb[8].mxu1 %vm712_vm1, %v685_v52 }
  0x40   : > { %1161 = vperm.xlu1 %2931, %v669_v33   ;;  %2597 = vmatprep.mubr.msk.f32.mxu1 %vm712_vm1, %v686_v55  ;;  %v1941_v33 = vld [vmem:[%s3834_s10 + $0x8] sm:$0xff] }
  0x41   : > { %1156 = vperm.xlu0 %2930, %v668_v34   ;;  %v1940_v34 = vld [vmem:[%s3834_s10] sm:$0xff] }
  0x43   : > { %2598 = vmatmul.mubr.msk.f32.gmra.mrb[10].mxu1 %vm712_vm1, %v687_v56 }
  0x44   : > { %1081 = vperm.xlu1 %2931, %v653_v37   ;;  %2600 = vmatprep.mubr.msk.f32.mxu1 %vm712_vm1, %v688_v59  ;;  %v1942_v37 = vld [vmem:[%s3834_s10 + $0x10] sm:$0xff] }
  0x45   : > { %1076 = vperm.xlu0 %2930, %v652_v38   ;;  %v2102_v38 = vld [vmem:[%s3835_s11 + $0x8] sm:$0xff] }
  0x47   : > { %2601 = vmatmul.mubr.msk.f32.gmra.mrb[12].mxu1 %vm712_vm1, %v689_v60 }
  0x48   : > { %1171 = vperm.xlu1 %2931, %v671_v41   ;;  %2603 = vmatprep.mubr.msk.f32.mxu1 %vm712_vm1, %v690_v63  ;;  %v1944_v41 = vld [vmem:[%s3834_s10 + $0x20] sm:$0xff] }
  0x49   : > { %1166 = vperm.xlu0 %2930, %v670_v42   ;;  %v2104_v42 = vld [vmem:[%s3835_s11 + $0x18] sm:$0xff] }
  0x4b   : > { %2604 = vmatmul.mubr.msk.f32.gmra.mrb[14].mxu1 %vm712_vm1, %v691_v0 }
  0x4c   : > { %1091 = vperm.xlu1 %2931, %v655_v45   ;;  %2606 = vmatprep.mubr.msk.f32.mxu1 %vm712_vm1, %v692_v3  ;;  %v1946_v45 = vld [vmem:[%s3834_s10 + $0x30] sm:$0xff] }
  0x4d   : > { %1086 = vperm.xlu0 %2930, %v654_v46   ;;  %v2106_v46 = vld [vmem:[%s3835_s11 + $0x28] sm:$0xff] }
  0x4f   : > { %2607 = vmatmul.mubr.msk.f32.gmra.mrb[16].mxu1 %vm712_vm1, %v693_v4 }
  0x50   : > { %1181 = vperm.xlu1 %2931, %v673_v49   ;;  %2609 = vmatprep.mubr.msk.f32.mxu1 %vm712_vm1, %v694_v7  ;;  %v2107_v49 = vld [vmem:[%s3835_s11 + $0x30] sm:$0xff]  ;;  %v1229_v7 = vld [vmem:[%s3830_s6 + $0x18] sm:$0xff] }
  0x51   : > { %1176 = vperm.xlu0 %2930, %v672_v50   ;;  %v2178_v50 = vld [vmem:[#allocation2] sm:$0x1] }
  0x53   : > { %2610 = vmatmul.mubr.msk.f32.gmra.mrb[18].mxu1 %vm712_vm1, %v695_v8  ;;  %v1230_v8 = vld [vmem:[%s3830_s6 + $0x20] sm:$0xff] }
  0x54   : > { %1101 = vperm.xlu1 %2931, %v657_v53   ;;  %2612 = vmatprep.mubr.msk.f32.mxu1 %vm712_vm1, %v696_v11  ;;  %v1233_v11 = vld [vmem:[%s3830_s6 + $0x38] sm:$0xff] }
  0x55   : > { %1096 = vperm.xlu0 %2930, %v656_v54  }
  0x57   : > { %2613 = vmatmul.mubr.msk.f32.gmra.mrb[20].mxu1 %vm712_vm1, %v697_v12  ;;  %v1234_v12 = vld [vmem:[%s3830_s6 + $0x40] sm:$0xff] }
  0x58   : > { %1191 = vperm.xlu1 %2931, %v675_v57   ;;  %2615 = vmatprep.mubr.msk.f32.mxu1 %vm712_vm1, %v698_v15  ;;  %v1237_v15 = vld [vmem:[%s3830_s6 + $0x58] sm:$0xff] }
  0x59   : > { %1186 = vperm.xlu0 %2930, %v674_v58  }
  0x5b   : > { %2616 = vmatmul.mubr.msk.f32.gmra.mrb[22].mxu1 %vm712_vm1, %v699_v16  ;;  %v1238_v16 = vld [vmem:[%s3830_s6 + $0x60] sm:$0xff] }
  0x5c   : > { %1111 = vperm.xlu1 %2931, %v659_v61   ;;  %2618 = vmatprep.mubr.msk.f32.mxu1 %vm712_vm1, %v700_v19  ;;  %v1241_v19 = vld [vmem:[%s3830_s6 + $0x78] sm:$0xff] }
  0x5d   : > { %1106 = vperm.xlu0 %2930, %v658_v62  }
  0x5f   : > { %2619 = vmatmul.mubr.msk.f32.gmra.mrb[24].mxu1 %vm712_vm1, %v701_v22  ;;  %v1244_v22 = vld [vmem:[%s3830_s6 + $0x90] sm:$0xff] }
  0x60   : > { %1698 = vperm.xlu1 %2931, %v1676_v1   ;;  %2621 = vmatprep.mubr.msk.f32.mxu1 %vm712_vm1, %v702_v25  ;;  %v1247_v25 = vld [vmem:[%s3830_s6 + $0xa8] sm:$0xff] }
  0x61   : > { %1693 = vperm.xlu0 %2930, %v1675_v2  }
  0x63   : > { %2622 = vmatmul.mubr.msk.f32.gmra.mrb[26].mxu1 %vm712_vm1, %v703_v26  ;;  %v1248_v26 = vld [vmem:[%s3830_s6 + $0xb0] sm:$0xff] }
  0x64   : > { %1708 = vperm.xlu1 %2931, %v1678_v5   ;;  %2624 = vmatprep.mubr.msk.f32.mxu1 %vm712_vm1, %v704_v29  ;;  %v1227_v5 = vld [vmem:[%s3830_s6 + $0x8] sm:$0xff] }
  0x65   : > { %1703 = vperm.xlu0 %2930, %v1677_v6   ;;  %v1228_v6 = vld [vmem:[%s3830_s6 + $0x10] sm:$0xff]  ;;  %v1251_v29 = vld [vmem:[%s3830_s6 + $0xc8] sm:$0xff] }
  0x67   : > { %2625 = vmatmul.mubr.msk.f32.gmra.mrb[28].mxu1 %vm712_vm1, %v705_v30  ;;  %v1252_v30 = vld [vmem:[%s3830_s6 + $0xd0] sm:$0xff] }
  0x68   : > { %1718 = vperm.xlu1 %2931, %v1680_v9   ;;  %2627 = vmatprep.mubr.msk.f32.mxu1 %vm712_vm1, %v706_v31  ;;  %v1231_v9 = vld [vmem:[%s3830_s6 + $0x28] sm:$0xff]  ;;  %v1253_v31 = vld [vmem:[%s3830_s6 + $0xd8] sm:$0xff] }
  0x69   : > { %1713 = vperm.xlu0 %2930, %v1679_v10   ;;  %v1232_v10 = vld [vmem:[%s3830_s6 + $0x30] sm:$0xff] }
  0x6b   : > { %2628 = vmatmul.mubr.msk.f32.gmra.mrb[30].mxu1 %vm712_vm1, %v707_v32  ;;  %v1254_v32 = vld [vmem:[%s3830_s6 + $0xe0] sm:$0xff] }
  0x6c   : > { %1728 = vperm.xlu1 %2931, %v1682_v13   ;;  %2638 = vmatprep.mubr.msk.f32.mxu1 %vm712_vm1, %v1226_v35  ;;  %v1235_v13 = vld [vmem:[%s3830_s6 + $0x48] sm:$0xff]  ;;  %v1257_v35 = vld [vmem:[%s3830_s6 + $0xf8] sm:$0xff] }
  0x6d   : > { %1723 = vperm.xlu0 %2930, %v1681_v14   ;;  %v1236_v14 = vld [vmem:[%s3830_s6 + $0x50] sm:$0xff] }
  0x70   : > { %1738 = vperm.xlu1 %2931, %v1684_v17   ;;  %v1239_v17 = vld [vmem:[%s3830_s6 + $0x68] sm:$0xff] }
  0x71   : > { %1733 = vperm.xlu0 %2930, %v1683_v18   ;;  %v1240_v18 = vld [vmem:[%s3830_s6 + $0x70] sm:$0xff] }
  0x74   : > { %1748 = vperm.xlu1 %2931, %v1686_v20   ;;  %v1242_v20 = vld [vmem:[%s3830_s6 + $0x80] sm:$0xff] }
  0x75   : > { %1743 = vperm.xlu0 %2930, %v1685_v21   ;;  %v1243_v21 = vld [vmem:[%s3830_s6 + $0x88] sm:$0xff] }
  0x78   : > { %1758 = vperm.xlu1 %2931, %v1688_v23   ;;  %v1245_v23 = vld [vmem:[%s3830_s6 + $0x98] sm:$0xff] }
  0x79   : > { %1753 = vperm.xlu0 %2930, %v1687_v24   ;;  %v1246_v24 = vld [vmem:[%s3830_s6 + $0xa0] sm:$0xff] }
  0x7c   : > { %1768 = vperm.xlu1 %2931, %v1690_v27   ;;  %v1249_v27 = vld [vmem:[%s3830_s6 + $0xb8] sm:$0xff] }
  0x7d   : > { %1763 = vperm.xlu0 %2930, %v1689_v28   ;;  %v1250_v28 = vld [vmem:[%s3830_s6 + $0xc0] sm:$0xff] }
  0x80   : > { %1955 = vperm.xlu1 %2931, %v1941_v33   ;;  %v1255_v33 = vld [vmem:[%s3830_s6 + $0xe8] sm:$0xff] }
  0x81   : > { %1950 = vperm.xlu0 %2930, %v1940_v34   ;;  %v1256_v34 = vld [vmem:[%s3830_s6 + $0xf0] sm:$0xff] }
  0x84   : > { %1965 = vperm.xlu1 %2931, %v1943_v36  }
  0x85   : > { %1960 = vperm.xlu0 %2930, %v1942_v37  }
  0x88   : > { %2116 = vperm.xlu1 %2931, %v2102_v38   ;;  %v1644_v38 = vld [vmem:[%s3831_s7 + $0x8] sm:$0xff] }
  0x89   : > { %2111 = vperm.xlu0 %2930, %v2101_v39   ;;  %1835 = vmatprep.mubr.f32.mxu0 %v1644_v38 }
  0x8c   : > { %2121 = vperm.xlu1 %2931, %v2103_v40  }
  0x8d   : > { %1970 = vperm.xlu0 %2930, %v1944_v41  }
  0x90   : > { %2126 = vperm.xlu1 %2931, %v2104_v42  }
  0x91   : > { %1975 = vperm.xlu0 %2930, %v1945_v43  }
  0x94   : > { %2131 = vperm.xlu1 %2931, %v2105_v44   ;;  %v525_v51 = vpop.permute.xlu0 %524  ;;  %v535_v52 = vpop.permute.xlu1 %534 }
  0x95   : > { %1980 = vperm.xlu0 %2930, %v1946_v45  }
  0x98   : > { %2136 = vperm.xlu1 %2931, %v2106_v46   ;;  %v530_v53 = vpop.permute.xlu0 %529  ;;  %v540_v59 = vpop.permute.xlu1 %539 }
  0x99   : > { %1985 = vperm.xlu0 %2930, %v1947_v47  }
  0x9c   : > { %2146 = vperm.xlu1 %2931, %v2108_v48  }
  0x9d   : > { %2141 = vperm.xlu0 %2930, %v2107_v49  }
  0x9f   : > { %v3572_v36 = vpop.permute.xlu1 %1121 }
  0xa0   : > { %v3574_v37 = vpop.permute.xlu0 %1116 }
  0xa1   : > { %2181 = vperm.xlu0 %2930, %v2178_v50  }
  0xa3   : > { %v1042_v39 = vpop.permute.xlu1 %1041 }
  0xa4   : > { %v1037_v40 = vpop.permute.xlu0 %1036 }
  0xa7   : > { %v3579_v41 = vpop.permute.xlu1 %1131 }
  0xa8   : > { %v3581_v42 = vpop.permute.xlu0 %1126 }
  0xab   : > { %v1052_v43 = vpop.permute.xlu1 %1051 }
  0xac   : > { %v1047_v44 = vpop.permute.xlu0 %1046 }
  0xaf   : > { %v3583_v45 = vpop.permute.xlu1 %1141 }
  0xb0   : > { %v3585_v46 = vpop.permute.xlu0 %1136 }
  0xb3   : > { %v1062_v47 = vpop.permute.xlu1 %1061 }
  0xb4   : > { %v1057_v48 = vpop.permute.xlu0 %1056 }
  0xb7   : > { %v3587_v49 = vpop.permute.xlu1 %1151 }
  0xb8   : > { %v3589_v50 = vpop.permute.xlu0 %1146 }
  0xf5   : > { %v2570_v54 = vpop.f32.mrb[0].mxu0 }
  0xf6   : > { %v627_v55 = vadd.f32 %v2570_v54, %v530_v53  ;;  %v621_v56 = vpop.f32.mrb[1].mxu0 }
  0xf7   : > { %v622_v57 = vadd.f32 %v621_v56, %v525_v51  ;;  %v1072_v51 = vpop.permute.xlu1 %1071 }
  0xf8   : > { %v641_v58 = vmax.f32 %v627_v55, 0.0 }
  0xf9   : > { %v640_v60 = vmax.f32 %v622_v57, 0.0  ;;  %v2573_v61 = vpop.f32.mrb[2].mxu0 }
  0xfa   : > { %v637_v62 = vadd.f32 %v2573_v61, %v540_v59  ;;  %v631_v63 = vpop.f32.mrb[3].mxu0 }
  0xfb   : > { %v2738_v0 = vpack.c.bf16 %v641_v58, %v640_v60  ;;  %v632_v1 = vadd.f32 %v631_v63, %v535_v52  ;;  %v1067_v52 = vpop.permute.xlu0 %1066  ;;  %v3591_v53 = vpop.permute.xlu1 %1161 }
  0xfc   : > { %v643_v2 = vmax.f32 %v637_v62, 0.0 }
  0xfd   : > { %v642_v3 = vmax.f32 %v632_v1, 0.0  ;;  %2739 = vmatprep.subr.bf16.mxu1 %v2738_v0 }
  0xfe   : > { %2741 = vmatpush3.bf16.msra.mxu1 %v2738_v0 }
  0xff   : > { %v2742_v4 = vpack.c.bf16 %v643_v2, %v642_v3  ;;  %v3593_v54 = vpop.permute.xlu0 %1156  ;;  %v1082_v55 = vpop.permute.xlu1 %1081 }
 0x101   : > { %2743 = vmatprep.subr.bf16.mxu1 %v2742_v4 }
 0x102   : > { %2745 = vmatpush3.bf16.msra.mxu1 %v2742_v4 }
 0x103   : > { %v1077_v56 = vpop.permute.xlu0 %1076  ;;  %v3595_v57 = vpop.permute.xlu1 %1171 }
 0x105   : > { %2639 = vmatmul.mubr.msk.f32.vlgmr.msra.gmra.mrb[0].mxu1 %vm712_vm1, %v1227_v5 }
 0x106   : > { %2641 = vmatprep.mubr.msk.f32.mxu1 %vm712_vm1, %v1228_v6 }
 0x107   : > { %v3597_v58 = vpop.permute.xlu0 %1166  ;;  %v1092_v0 = vpop.permute.xlu1 %1091 }
 0x109   : > { %2642 = vmatmul.mubr.msk.f32.gmra.mrb[2].mxu1 %vm712_vm1, %v1229_v7 }
 0x10a   : > { %2644 = vmatprep.mubr.msk.f32.mxu1 %vm712_vm1, %v1230_v8 }
 0x10b   : > { %v1087_v3 = vpop.permute.xlu0 %1086 }
 0x10d   : > { %2645 = vmatmul.mubr.msk.f32.gmra.mrb[4].mxu1 %vm712_vm1, %v1231_v9 }
 0x10e   : > { %2647 = vmatprep.mubr.msk.f32.mxu1 %vm712_vm1, %v1232_v10 }
 0x111   : > { %2648 = vmatmul.mubr.msk.f32.gmra.mrb[6].mxu1 %vm712_vm1, %v1233_v11 }
 0x112   : > { %2650 = vmatprep.mubr.msk.f32.mxu1 %vm712_vm1, %v1234_v12 }
 0x115   : > { %2651 = vmatmul.mubr.msk.f32.gmra.mrb[8].mxu1 %vm712_vm1, %v1235_v13  ;;  %v3601_v13 = vpop.permute.xlu1 %1181 }
 0x116   : > { %2653 = vmatprep.mubr.msk.f32.mxu1 %vm712_vm1, %v1236_v14 }
 0x119   : > { %2654 = vmatmul.mubr.msk.f32.gmra.mrb[10].mxu1 %vm712_vm1, %v1237_v15 }
 0x11a   : > { %2656 = vmatprep.mubr.msk.f32.mxu1 %vm712_vm1, %v1238_v16  ;;  %v3605_v16 = vpop.permute.xlu0 %1176 }
 0x11d   : > { %2657 = vmatmul.mubr.msk.f32.gmra.mrb[12].mxu1 %vm712_vm1, %v1239_v17 }
 0x11e   : > { %2659 = vmatprep.mubr.msk.f32.mxu1 %vm712_vm1, %v1240_v18 }
 0x121   : > { %2660 = vmatmul.mubr.msk.f32.gmra.mrb[14].mxu1 %vm712_vm1, %v1241_v19 }
 0x122   : > { %2662 = vmatprep.mubr.msk.f32.mxu1 %vm712_vm1, %v1242_v20 }
 0x125   : > { %2663 = vmatmul.mubr.msk.f32.gmra.mrb[16].mxu1 %vm712_vm1, %v1243_v21 }
 0x126   : > { %2665 = vmatprep.mubr.msk.f32.mxu1 %vm712_vm1, %v1244_v22 }
 0x129   : > { %2666 = vmatmul.mubr.msk.f32.gmra.mrb[18].mxu1 %vm712_vm1, %v1245_v23 }
 0x12a   : > { %2668 = vmatprep.mubr.msk.f32.mxu1 %vm712_vm1, %v1246_v24 }
 0x12d   : > { %2669 = vmatmul.mubr.msk.f32.gmra.mrb[20].mxu1 %vm712_vm1, %v1247_v25  ;;  %v1102_v25 = vpop.permute.xlu1 %1101 }
 0x12e   : > { %2671 = vmatprep.mubr.msk.f32.mxu1 %vm712_vm1, %v1248_v26 }
 0x131   : > { %2672 = vmatmul.mubr.msk.f32.gmra.mrb[22].mxu1 %vm712_vm1, %v1249_v27 }
 0x132   : > { %2674 = vmatprep.mubr.msk.f32.mxu1 %vm712_vm1, %v1250_v28  ;;  %v1097_v28 = vpop.permute.xlu0 %1096 }
 0x135   : > { %2675 = vmatmul.mubr.msk.f32.gmra.mrb[24].mxu1 %vm712_vm1, %v1251_v29 }
 0x136   : > { %2677 = vmatprep.mubr.msk.f32.mxu1 %vm712_vm1, %v1252_v30 }
 0x139   : > { %2678 = vmatmul.mubr.msk.f32.gmra.mrb[26].mxu1 %vm712_vm1, %v1253_v31 }
 0x13a   : > { %2680 = vmatprep.mubr.msk.f32.mxu1 %vm712_vm1, %v1254_v32 }
 0x13d   : > { %2681 = vmatmul.mubr.msk.f32.gmra.mrb[28].mxu1 %vm712_vm1, %v1255_v33 }
 0x13e   : > { %2683 = vmatprep.mubr.msk.f32.mxu1 %vm712_vm1, %v1256_v34 }
 0x141   : > { %2684 = vmatmul.mubr.msk.f32.gmra.mrb[30].mxu1 %vm712_vm1, %v1257_v35 }
 0x1d8   : > { %v2640_v59 = vpop.f32.mrb[0].mxu1 }
 0x1d9   : > { %v2810_v60 = vadd.f32 %v2640_v59, %v1042_v39  ;;  %v1420_v61 = vpop.f32.mrb[1].mxu1 }
 0x1da   : > { %v2811_v62 = vadd.f32 %v1420_v61, %v1037_v40  ;;  %v3611_v40 = vpop.permute.xlu1 %1191 }
 0x1db   : > { %v1612_v63 = vmax.f32 %v2810_v60, 0.0 }
 0x1dc   : > { %v1611_v1 = vmax.f32 %v2811_v62, 0.0  ;;  %v2643_v2 = vpop.f32.mrb[2].mxu1 }
 0x1dd   : > { %v2812_v4 = vadd.f32 %v2643_v2, %v1052_v43  ;;  %v1430_v5 = vpop.f32.mrb[3].mxu1 }
 0x1de   : > { %v3599_v6 = vpack.c.bf16 %v1612_v63, %v1611_v1  ;;  %v2813_v7 = vadd.f32 %v1430_v5, %v1047_v44  ;;  %v1112_v62 = vpop.permute.xlu1 %1111 }
 0x1df   : > { %v1614_v8 = vmax.f32 %v2812_v4, 0.0 }
 0x1e0   : > { %v1613_v9 = vmax.f32 %v2813_v7, 0.0  ;;  %v2646_v10 = vpop.f32.mrb[4].mxu1 }
 0x1e1   : > { %v2814_v11 = vadd.f32 %v2646_v10, %v1062_v47  ;;  %v1440_v12 = vpop.f32.mrb[5].mxu1  ;;  %v3615_v47 = vpop.permute.xlu0 %1186 }
 0x1e2   : > { %v3603_v14 = vpack.c.bf16 %v1614_v8, %v1613_v9  ;;  %v2815_v15 = vadd.f32 %v1440_v12, %v1057_v48 }
 0x1e3   : > { %v1616_v17 = vmax.f32 %v2814_v11, 0.0 }
 0x1e4   : > { %v1615_v18 = vmax.f32 %v2815_v15, 0.0  ;;  %v2649_v19 = vpop.f32.mrb[6].mxu1 }
 0x1e5   : > { %v2816_v20 = vadd.f32 %v2649_v19, %v1072_v51  ;;  %v1450_v21 = vpop.f32.mrb[7].mxu1  ;;  %v1107_v1 = vpop.permute.xlu0 %1106 }
 0x1e6   : > { %v3607_v22 = vpack.c.bf16 %v1616_v17, %v1615_v18  ;;  %v2817_v23 = vadd.f32 %v1450_v21, %v1067_v52 }
 0x1e7   : > { %v1618_v24 = vmax.f32 %v2816_v20, 0.0 }
 0x1e8   : > { %v1617_v26 = vmax.f32 %v2817_v23, 0.0  ;;  %v2652_v27 = vpop.f32.mrb[8].mxu1 }
 0x1e9   : > { %v2818_v29 = vadd.f32 %v2652_v27, %v1082_v55  ;;  %v1460_v30 = vpop.f32.mrb[9].mxu1 }
 0x1ea   : > { %v3609_v31 = vpack.c.bf16 %v1618_v24, %v1617_v26  ;;  %v2819_v32 = vadd.f32 %v1460_v30, %v1077_v56 }
 0x1eb   : > { %v1620_v33 = vmax.f32 %v2818_v29, 0.0 }
 0x1ec   : > { %v1619_v34 = vmax.f32 %v2819_v32, 0.0  ;;  %v2655_v35 = vpop.f32.mrb[10].mxu1 }
 0x1ed   : > { %v2820_v38 = vadd.f32 %v2655_v35, %v1092_v0  ;;  %v1470_v39 = vpop.f32.mrb[11].mxu1 }
 0x1ee   : > { %v3613_v43 = vpack.c.bf16 %v1620_v33, %v1619_v34  ;;  %v2821_v44 = vadd.f32 %v1470_v39, %v1087_v3 }
 0x1ef   : > { %v1622_v48 = vmax.f32 %v2820_v38, 0.0 }
 0x1f0   : > { %v1621_v51 = vmax.f32 %v2821_v44, 0.0  ;;  %v2658_v52 = vpop.f32.mrb[12].mxu1 }
 0x1f1   : > { %v2822_v55 = vadd.f32 %v2658_v52, %v1102_v25  ;;  %v1480_v59 = vpop.f32.mrb[13].mxu1 }
 0x1f2   : > { %v3617_v60 = vpack.c.bf16 %v1622_v48, %v1621_v51  ;;  %v2823_v56 = vadd.f32 %v1480_v59, %v1097_v28 }
 0x1f3   : > { %v1624_v61 = vmax.f32 %v2822_v55, 0.0 }
 0x1f4   : > { %v1623_v63 = vmax.f32 %v2823_v56, 0.0  ;;  %v2661_v0 = vpop.f32.mrb[14].mxu1 }
 0x1f5   : > { %v2824_v2 = vadd.f32 %v2661_v0, %v1112_v62  ;;  %v1490_v4 = vpop.f32.mrb[15].mxu1 }
 0x1f6   : > { %v3619_v5 = vpack.c.bf16 %v1624_v61, %v1623_v63  ;;  %v2825_v3 = vadd.f32 %v1490_v4, %v1107_v1 }
 0x1f7   : > { %v1626_v7 = vmax.f32 %v2824_v2, 0.0 }
 0x1f8   : > { %v1625_v8 = vmax.f32 %v2825_v3, 0.0  ;;  %v2664_v9 = vpop.f32.mrb[16].mxu1 }
 0x1f9   : > { %v2826_v10 = vadd.f32 %v2664_v9, %v3572_v36  ;;  %v1500_v11 = vpop.f32.mrb[17].mxu1  ;;  %v1652_v9 = vld [vmem:[%s3831_s7 + $0x48] sm:$0xff] }
 0x1fa   : > { %v3622_v12 = vpack.c.bf16 %v1626_v7, %v1625_v8  ;;  %v2827_v15 = vadd.f32 %v1500_v11, %v3574_v37  ;;  %v1650_v7 = vld [vmem:[%s3831_s7 + $0x38] sm:$0xff]  ;;  %v1649_v8 = vld [vmem:[%s3831_s7 + $0x30] sm:$0xff] }
 0x1fb   : > { %v1628_v17 = vmax.f32 %v2826_v10, 0.0  ;;  %v1651_v10 = vld [vmem:[%s3831_s7 + $0x40] sm:$0xff]  ;;  %v1654_v11 = vld [vmem:[%s3831_s7 + $0x58] sm:$0xff] }
 0x1fc   : > { %v1627_v18 = vmax.f32 %v2827_v15, 0.0  ;;  %v2667_v19 = vpop.f32.mrb[18].mxu1  ;;  %v1656_v15 = vld [vmem:[%s3831_s7 + $0x68] sm:$0xff] }
 0x1fd   : > { %v2828_v20 = vadd.f32 %v2667_v19, %v3579_v41  ;;  %v1510_v21 = vpop.f32.mrb[19].mxu1  ;;  %v1657_v19 = vld [vmem:[%s3831_s7 + $0x70] sm:$0xff] }
 0x1fe   : > { %v2746_v23 = vpack.c.bf16 %v1628_v17, %v1627_v18  ;;  %v2829_v24 = vadd.f32 %v1510_v21, %v3581_v42  ;;  %v1655_v17 = vld [vmem:[%s3831_s7 + $0x60] sm:$0xff]  ;;  %v1658_v18 = vld [vmem:[%s3831_s7 + $0x78] sm:$0xff] }
 0x1ff   : > { %v1630_v25 = vmax.f32 %v2828_v20, 0.0  ;;  %v1660_v20 = vld [vmem:[%s3831_s7 + $0x88] sm:$0xff]  ;;  %v1659_v21 = vld [vmem:[%s3831_s7 + $0x80] sm:$0xff] }
 0x200   : > { %v1629_v26 = vmax.f32 %v2829_v24, 0.0  ;;  %v2670_v27 = vpop.f32.mrb[20].mxu1  ;;  %2747 = vmatprep.subr.bf16.mxu0 %v2746_v23  ;;  %v1662_v23 = vld [vmem:[%s3831_s7 + $0x98] sm:$0xff]  ;;  %v1661_v24 = vld [vmem:[%s3831_s7 + $0x90] sm:$0xff] }
 0x201   : > { %v2830_v36 = vadd.f32 %v2670_v27, %v3583_v45  ;;  %v1520_v28 = vpop.f32.mrb[21].mxu1  ;;  %2749 = vmatpush3.bf16.msra.mxu0 %v3599_v6  ;;  %v1666_v27 = vld [vmem:[%s3831_s7 + $0xb8] sm:$0xff] }
 0x202   : > { %v2750_v29 = vpack.c.bf16 %v1630_v25, %v1629_v26  ;;  %v2831_v37 = vadd.f32 %v1520_v28, %v3585_v46  ;;  %v1664_v25 = vld [vmem:[%s3831_s7 + $0xa8] sm:$0xff]  ;;  %v1663_v26 = vld [vmem:[%s3831_s7 + $0xa0] sm:$0xff] }
 0x203   : > { %v1632_v30 = vmax.f32 %v2830_v36, 0.0  ;;  %v1665_v36 = vld [vmem:[%s3831_s7 + $0xb0] sm:$0xff]  ;;  %v1668_v28 = vld [vmem:[%s3831_s7 + $0xc8] sm:$0xff] }
 0x204   : > { %v1631_v32 = vmax.f32 %v2831_v37, 0.0  ;;  %v2673_v33 = vpop.f32.mrb[22].mxu1  ;;  %2751 = vmatprep.subr.bf16.mxu0 %v2750_v29  ;;  %v1667_v29 = vld [vmem:[%s3831_s7 + $0xc0] sm:$0xff]  ;;  %v1670_v37 = vld [vmem:[%s3831_s7 + $0xd8] sm:$0xff] }
 0x205   : > { %v2832_v41 = vadd.f32 %v2673_v33, %v3587_v49  ;;  %v1530_v34 = vpop.f32.mrb[23].mxu1  ;;  %2753 = vmatpush3.bf16.msra.mxu0 %v3603_v14  ;;  %v1671_v33 = vld [vmem:[%s3831_s7 + $0xe0] sm:$0xff] }
 0x206   : > { %v2754_v42 = vpack.c.bf16 %v1632_v30, %v1631_v32  ;;  %v2833_v35 = vadd.f32 %v1530_v34, %v3589_v50  ;;  %v1669_v30 = vld [vmem:[%s3831_s7 + $0xd0] sm:$0xff]  ;;  %v1672_v32 = vld [vmem:[%s3831_s7 + $0xe8] sm:$0xff] }
 0x207   : > { %v1634_v38 = vmax.f32 %v2832_v41, 0.0  ;;  %v1674_v41 = vld [vmem:[%s3831_s7 + $0xf8] sm:$0xff]  ;;  %v1673_v34 = vld [vmem:[%s3831_s7 + $0xf0] sm:$0xff] }
 0x208   : > { %v1633_v45 = vmax.f32 %v2833_v35, 0.0  ;;  %v2676_v39 = vpop.f32.mrb[24].mxu1  ;;  %2755 = vmatprep.subr.bf16.mxu0 %v2754_v42  ;;  %v1932_v42 = vld [vmem:[%s3833_s9] sm:$0xff] }
 0x209   : > { %v2834_v6 = vadd.f32 %v2676_v39, %v3591_v53  ;;  %v1540_v44 = vpop.f32.mrb[25].mxu1  ;;  %2757 = vmatpush3.bf16.msra.mxu0 %v3607_v22 }
 0x20a   : > { %v2758_v46 = vpack.c.bf16 %v1634_v38, %v1633_v45  ;;  %v2835_v48 = vadd.f32 %v1540_v44, %v3593_v54 }
 0x20b   : > { %v1636_v51 = vmax.f32 %v2834_v6, 0.0  ;;  %v1694_v6 = vpop.permute.xlu0 %1693 }
 0x20c   : > { %v1635_v49 = vmax.f32 %v2835_v48, 0.0  ;;  %v2679_v52 = vpop.f32.mrb[26].mxu1  ;;  %2759 = vmatprep.subr.bf16.mxu0 %v2758_v46 }
 0x20d   : > { %v2836_v14 = vadd.f32 %v2679_v52, %v3595_v57  ;;  %v1550_v55 = vpop.f32.mrb[27].mxu1  ;;  %2761 = vmatpush3.bf16.msra.mxu0 %v3609_v31 }
 0x20e   : > { %v2762_v50 = vpack.c.bf16 %v1636_v51, %v1635_v49  ;;  %v2837_v59 = vadd.f32 %v1550_v55, %v3597_v58  ;;  %v1699_v51 = vpop.permute.xlu1 %1698 }
 0x20f   : > { %v1638_v56 = vmax.f32 %v2836_v14, 0.0 }
 0x210   : > { %v1637_v53 = vmax.f32 %v2837_v59, 0.0  ;;  %v2682_v61 = vpop.f32.mrb[28].mxu1  ;;  %2763 = vmatprep.subr.bf16.mxu0 %v2762_v50 }
 0x211   : > { %v2838_v22 = vadd.f32 %v2682_v61, %v3601_v13  ;;  %v1560_v62 = vpop.f32.mrb[29].mxu1  ;;  %2765 = vmatpush3.bf16.msra.mxu0 %v3613_v43  ;;  %v1704_v61 = vpop.permute.xlu0 %1703 }
 0x212   : > { %v2766_v54 = vpack.c.bf16 %v1638_v56, %v1637_v53  ;;  %v2839_v63 = vadd.f32 %v1560_v62, %v3605_v16  ;;  %v1643_v16 = vld [vmem:[%s3831_s7] sm:$0xff] }
 0x213   : > { %v1640_v0 = vmax.f32 %v2838_v22, 0.0 }
 0x214   : > { %v1639_v57 = vmax.f32 %v2839_v63, 0.0  ;;  %v2685_v1 = vpop.f32.mrb[30].mxu1  ;;  %2767 = vmatprep.subr.bf16.mxu0 %v2766_v54  ;;  %v1709_v63 = vpop.permute.xlu1 %1708 }
 0x215   : > { %v2840_v31 = vadd.f32 %v2685_v1, %v3611_v40  ;;  %v1570_v2 = vpop.f32.mrb[31].mxu1  ;;  %2769 = vmatpush3.bf16.msra.mxu0 %v3617_v60  ;;  %v1646_v40 = vld [vmem:[%s3831_s7 + $0x18] sm:$0xff]  ;;  %v1648_v60 = vld [vmem:[%s3831_s7 + $0x28] sm:$0xff] }
 0x216   : > { %v2770_v58 = vpack.c.bf16 %v1640_v0, %v1639_v57  ;;  %v2841_v4 = vadd.f32 %v1570_v2, %v3615_v47  ;;  %v1645_v47 = vld [vmem:[%s3831_s7 + $0x10] sm:$0xff] }
 0x217   : > { %v1642_v3 = vmax.f32 %v2840_v31, 0.0 }
 0x218   : > { %v1641_v13 = vmax.f32 %v2841_v4, 0.0  ;;  %2771 = vmatprep.subr.bf16.mxu0 %v2770_v58 }
 0x219   : > { %2773 = vmatpush3.bf16.msra.mxu0 %v3619_v5  ;;  %v1647_v5 = vld [vmem:[%s3831_s7 + $0x20] sm:$0xff] }
 0x21a   : > { %v2774_v43 = vpack.c.bf16 %v1642_v3, %v1641_v13  ;;  %v1714_v13 = vpop.permute.xlu0 %1713 }
 0x21c   : > { %2775 = vmatprep.subr.bf16.mxu0 %v2774_v43 }
 0x21d   : > { %2777 = vmatpush3.bf16.msra.mxu0 %v3622_v12  ;;  %v1653_v12 = vld [vmem:[%s3831_s7 + $0x50] sm:$0xff] }
 0x220   : > { %1836 = vmatmul.mubr.f32.vlgmr.msra.gmra.mrb[4].mxu0 %v1643_v16 }
 0x221   : > { %1840 = vmatprep.mubr.f32.mxu0 %v1646_v40 }
 0x224   : > { %1841 = vmatmul.mubr.f32.gmra.mrb[6].mxu0 %v1645_v47  ;;  %v1719_v47 = vpop.permute.xlu1 %1718 }
 0x225   : > { %1845 = vmatprep.mubr.f32.mxu0 %v1648_v60 }
 0x228   : > { %1846 = vmatmul.mubr.f32.gmra.mrb[8].mxu0 %v1647_v5 }
 0x229   : > { %1850 = vmatprep.mubr.f32.mxu0 %v1650_v7 }
 0x22c   : > { %1851 = vmatmul.mubr.f32.gmra.mrb[10].mxu0 %v1649_v8 }
 0x22d   : > { %1855 = vmatprep.mubr.f32.mxu0 %v1652_v9 }
 0x230   : > { %1856 = vmatmul.mubr.f32.gmra.mrb[12].mxu0 %v1651_v10 }
 0x231   : > { %1860 = vmatprep.mubr.f32.mxu0 %v1654_v11 }
 0x234   : > { %1861 = vmatmul.mubr.f32.gmra.mrb[14].mxu0 %v1653_v12 }
 0x235   : > { %1865 = vmatprep.mubr.f32.mxu0 %v1656_v15  ;;  %v1724_v15 = vpop.permute.xlu0 %1723 }
 0x238   : > { %1866 = vmatmul.mubr.f32.gmra.mrb[16].mxu0 %v1655_v17 }
 0x239   : > { %1870 = vmatprep.mubr.f32.mxu0 %v1658_v18 }
 0x23c   : > { %1871 = vmatmul.mubr.f32.gmra.mrb[18].mxu0 %v1657_v19 }
 0x23d   : > { %1875 = vmatprep.mubr.f32.mxu0 %v1660_v20  ;;  %v1729_v20 = vpop.permute.xlu1 %1728 }
 0x240   : > { %1876 = vmatmul.mubr.f32.gmra.mrb[20].mxu0 %v1659_v21 }
 0x241   : > { %1880 = vmatprep.mubr.f32.mxu0 %v1662_v23 }
 0x244   : > { %1881 = vmatmul.mubr.f32.gmra.mrb[22].mxu0 %v1661_v24 }
 0x245   : > { %1885 = vmatprep.mubr.f32.mxu0 %v1664_v25 }
 0x248   : > { %1886 = vmatmul.mubr.f32.gmra.mrb[24].mxu0 %v1663_v26 }
 0x249   : > { %1890 = vmatprep.mubr.f32.mxu0 %v1666_v27 }
 0x24c   : > { %1891 = vmatmul.mubr.f32.gmra.mrb[26].mxu0 %v1665_v36 }
 0x24d   : > { %1895 = vmatprep.mubr.f32.mxu0 %v1668_v28 }
 0x250   : > { %1896 = vmatmul.mubr.f32.gmra.mrb[28].mxu0 %v1667_v29  ;;  %v1734_v29 = vpop.permute.xlu0 %1733 }
 0x251   : > { %1900 = vmatprep.mubr.f32.mxu0 %v1670_v37 }
 0x254   : > { %1901 = vmatmul.mubr.f32.gmra.mrb[30].mxu0 %v1669_v30 }
 0x255   : > { %1905 = vmatprep.mubr.f32.mxu0 %v1672_v32 }
 0x258   : > { %1906 = vmatmul.mubr.f32.gmra.mrb[32].mxu0 %v1671_v33  ;;  %v1739_v33 = vpop.permute.xlu1 %1738 }
 0x259   : > { %1910 = vmatprep.mubr.f32.mxu0 %v1674_v41 }
 0x25c   : > { %1911 = vmatmul.mubr.f32.gmra.mrb[34].mxu0 %v1673_v34 }
 0x25d   : > { %2718 = vmatprep.mubr.f32.mxu0 %v1932_v42 }
 0x2f3   : > { %v2494_v35 = vpop.f32.mrb[4].mxu0 }
 0x2f4   : > { %v2495_v38 = vpop.f32.mrb[5].mxu0 }
 0x2f5   : > { %v2496_v45 = vadd.f32 %v2495_v38, %v2494_v35 }
 0x2f7   : > { %v2497_v39 = vpop.f32.mrb[6].mxu0  ;;  %v1838_v46 = vadd.f32 %v2496_v45, %v1694_v6 }
 0x2f8   : > { %v2498_v44 = vpop.f32.mrb[7].mxu0 }
 0x2f9   : > { %v2499_v48 = vadd.f32 %v2498_v44, %v2497_v39  ;;  %v1916_v55 = vmax.f32 %v1838_v46, 0.0  ;;  %v1744_v44 = vpop.permute.xlu0 %1743 }
 0x2fb   : > { %v1843_v49 = vadd.f32 %v2499_v48, %v1699_v51  ;;  %v2500_v52 = vpop.f32.mrb[8].mxu0 }
 0x2fc   : > { %v2501_v14 = vpop.f32.mrb[9].mxu0 }
 0x2fd   : > { %v1917_v50 = vmax.f32 %v1843_v49, 0.0  ;;  %v2502_v59 = vadd.f32 %v2501_v14, %v2500_v52  ;;  %v1749_v49 = vpop.permute.xlu1 %1748 }
 0x2ff   : > { %v2503_v56 = vpop.f32.mrb[10].mxu0  ;;  %v2778_v53 = vpack.c.bf16 %v1917_v50, %v1916_v55  ;;  %v1848_v62 = vadd.f32 %v2502_v59, %v1704_v61 }
 0x300   : > { %v2504_v22 = vpop.f32.mrb[11].mxu0 }
 0x301   : > { %v2505_v54 = vadd.f32 %v2504_v22, %v2503_v56  ;;  %2779 = vmatprep.subr.bf16.mxu0 %v2778_v53  ;;  %v1918_v31 = vmax.f32 %v1848_v62, 0.0  ;;  %v1754_v22 = vpop.permute.xlu0 %1753 }
 0x302   : > { %2781 = vmatpush3.bf16.msra.mxu0 %v2778_v53 }
 0x303   : > { %v1853_v0 = vadd.f32 %v2505_v54, %v1709_v63  ;;  %v2506_v57 = vpop.f32.mrb[12].mxu0 }
 0x304   : > { %v2507_v1 = vpop.f32.mrb[13].mxu0 }
 0x305   : > { %v1919_v2 = vmax.f32 %v1853_v0, 0.0  ;;  %v2508_v58 = vadd.f32 %v2507_v1, %v2506_v57  ;;  %v1759_v0 = vpop.permute.xlu1 %1758 }
 0x307   : > { %v2509_v4 = vpop.f32.mrb[14].mxu0  ;;  %v2782_v3 = vpack.c.bf16 %v1919_v2, %v1918_v31  ;;  %v1858_v16 = vadd.f32 %v2508_v58, %v1714_v13 }
 0x308   : > { %v2510_v43 = vpop.f32.mrb[15].mxu0 }
 0x309   : > { %v2511_v40 = vadd.f32 %v2510_v43, %v2509_v4  ;;  %2783 = vmatprep.subr.bf16.mxu0 %v2782_v3  ;;  %v1920_v8 = vmax.f32 %v1858_v16, 0.0  ;;  %v1764_v43 = vpop.permute.xlu0 %1763 }
 0x30a   : > { %2785 = vmatpush3.bf16.msra.mxu0 %v2782_v3 }
 0x30b   : > { %v1863_v60 = vadd.f32 %v2511_v40, %v1719_v47  ;;  %v2512_v5 = vpop.f32.mrb[16].mxu0 }
 0x30c   : > { %v2513_v7 = vpop.f32.mrb[17].mxu0 }
 0x30d   : > { %v1921_v9 = vmax.f32 %v1863_v60, 0.0  ;;  %v2514_v10 = vadd.f32 %v2513_v7, %v2512_v5  ;;  %v1769_v60 = vpop.permute.xlu1 %1768 }
 0x30f   : > { %v2515_v11 = vpop.f32.mrb[18].mxu0  ;;  %v2786_v12 = vpack.c.bf16 %v1921_v9, %v1920_v8  ;;  %v1868_v18 = vadd.f32 %v2514_v10, %v1724_v15  ;;  %v1933_v10 = vld [vmem:[%s3833_s9 + $0x8] sm:$0xff]  ;;  %v1936_v15 = vld [vmem:[%s3833_s9 + $0x20] sm:$0xff] }
 0x310   : > { %v2516_v17 = vpop.f32.mrb[19].mxu0 }
 0x311   : > { %v2517_v19 = vadd.f32 %v2516_v17, %v2515_v11  ;;  %2787 = vmatprep.subr.bf16.mxu0 %v2786_v12  ;;  %v1922_v25 = vmax.f32 %v1868_v18, 0.0  ;;  %v1934_v11 = vld [vmem:[%s3833_s9 + $0x10] sm:$0xff]  ;;  %v1937_v17 = vld [vmem:[%s3833_s9 + $0x28] sm:$0xff] }
 0x312   : > { %2789 = vmatpush3.bf16.msra.mxu0 %v2786_v12  ;;  %v1935_v12 = vld [vmem:[%s3833_s9 + $0x18] sm:$0xff]  ;;  %v1938_v18 = vld [vmem:[%s3833_s9 + $0x30] sm:$0xff] }
 0x313   : > { %v1873_v21 = vadd.f32 %v2517_v19, %v1729_v20  ;;  %v2518_v23 = vpop.f32.mrb[20].mxu0  ;;  %v1939_v19 = vld [vmem:[%s3833_s9 + $0x38] sm:$0xff]  ;;  %v1956_v20 = vpop.permute.xlu1 %1955 }
 0x314   : > { %v2519_v24 = vpop.f32.mrb[21].mxu0 }
 0x315   : > { %v1923_v26 = vmax.f32 %v1873_v21, 0.0  ;;  %v2520_v27 = vadd.f32 %v2519_v24, %v2518_v23  ;;  %v1951_v21 = vpop.permute.xlu0 %1950 }
 0x317   : > { %v2521_v36 = vpop.f32.mrb[22].mxu0  ;;  %v2790_v28 = vpack.c.bf16 %v1923_v26, %v1922_v25  ;;  %v1878_v30 = vadd.f32 %v2520_v27, %v1734_v29  ;;  %v1966_v23 = vpop.permute.xlu1 %1965 }
 0x318   : > { %v2522_v37 = vpop.f32.mrb[23].mxu0 }
 0x319   : > { %v2523_v32 = vadd.f32 %v2522_v37, %v2521_v36  ;;  %2791 = vmatprep.subr.bf16.mxu0 %v2790_v28  ;;  %v1924_v35 = vmax.f32 %v1878_v30, 0.0  ;;  %v1961_v24 = vpop.permute.xlu0 %1960 }
 0x31a   : > { %2793 = vmatpush3.bf16.msra.mxu0 %v2790_v28 }
 0x31b   : > { %v1883_v41 = vadd.f32 %v2523_v32, %v1739_v33  ;;  %v2524_v34 = vpop.f32.mrb[24].mxu0  ;;  %v2117_v25 = vpop.permute.xlu1 %2116 }
 0x31c   : > { %v2525_v42 = vpop.f32.mrb[25].mxu0 }
 0x31d   : > { %v1925_v38 = vmax.f32 %v1883_v41, 0.0  ;;  %v2526_v45 = vadd.f32 %v2525_v42, %v2524_v34  ;;  %v2112_v26 = vpop.permute.xlu0 %2111 }
 0x31f   : > { %v2527_v39 = vpop.f32.mrb[26].mxu0  ;;  %v2794_v6 = vpack.c.bf16 %v1925_v38, %v1924_v35  ;;  %v1888_v48 = vadd.f32 %v2526_v45, %v1744_v44  ;;  %v2122_v27 = vpop.permute.xlu1 %2121 }
 0x320   : > { %v2528_v46 = vpop.f32.mrb[27].mxu0 }
 0x321   : > { %v2529_v51 = vadd.f32 %v2528_v46, %v2527_v39  ;;  %2795 = vmatprep.subr.bf16.mxu0 %v2794_v6  ;;  %v1926_v50 = vmax.f32 %v1888_v48, 0.0  ;;  %v1971_v36 = vpop.permute.xlu0 %1970 }
 0x322   : > { %2797 = vmatpush3.bf16.msra.mxu0 %v2794_v6 }
 0x323   : > { %v1893_v52 = vadd.f32 %v2529_v51, %v1749_v49  ;;  %v2530_v14 = vpop.f32.mrb[28].mxu0  ;;  %v2127_v28 = vpop.permute.xlu1 %2126 }
 0x324   : > { %v2531_v55 = vpop.f32.mrb[29].mxu0 }
 0x325   : > { %v1927_v59 = vmax.f32 %v1893_v52, 0.0  ;;  %v2532_v56 = vadd.f32 %v2531_v55, %v2530_v14  ;;  %v1976_v29 = vpop.permute.xlu0 %1975 }
 0x327   : > { %v2533_v53 = vpop.f32.mrb[30].mxu0  ;;  %v2798_v61 = vpack.c.bf16 %v1927_v59, %v1926_v50  ;;  %v1898_v54 = vadd.f32 %v2532_v56, %v1754_v22  ;;  %v2132_v34 = vpop.permute.xlu1 %2131 }
 0x328   : > { %v2534_v62 = vpop.f32.mrb[31].mxu0 }
 0x329   : > { %v2535_v63 = vadd.f32 %v2534_v62, %v2533_v53  ;;  %2799 = vmatprep.subr.bf16.mxu0 %v2798_v61  ;;  %v1928_v2 = vmax.f32 %v1898_v54, 0.0  ;;  %v1981_v38 = vpop.permute.xlu0 %1980 }
 0x32a   : > { %2801 = vmatpush3.bf16.msra.mxu0 %v2798_v61 }
 0x32b   : > { %v1903_v57 = vadd.f32 %v2535_v63, %v1759_v0  ;;  %v2536_v1 = vpop.f32.mrb[32].mxu0  ;;  %v2137_v22 = vpop.permute.xlu1 %2136 }
 0x32c   : > { %v2537_v31 = vpop.f32.mrb[33].mxu0 }
 0x32d   : > { %v1929_v58 = vmax.f32 %v1903_v57, 0.0  ;;  %v2538_v4 = vadd.f32 %v2537_v31, %v2536_v1  ;;  %v1986_v62 = vpop.permute.xlu0 %1985 }
 0x32f   : > { %v2539_v3 = vpop.f32.mrb[34].mxu0  ;;  %v2802_v13 = vpack.c.bf16 %v1929_v58, %v1928_v2  ;;  %v1908_v40 = vadd.f32 %v2538_v4, %v1764_v43 }
 0x330   : > { %v2540_v16 = vpop.f32.mrb[35].mxu0 }
 0x331   : > { %v2541_v47 = vadd.f32 %v2540_v16, %v2539_v3  ;;  %2803 = vmatprep.subr.bf16.mxu0 %v2802_v13  ;;  %v1930_v7 = vmax.f32 %v1908_v40, 0.0 }
 0x332   : > { %2805 = vmatpush3.bf16.msra.mxu0 %v2802_v13 }
 0x333   : > { %v1913_v5 = vadd.f32 %v2541_v47, %v1769_v60  ;;  %v2147_v60 = vpop.permute.xlu1 %2146 }
 0x335   : > { %v1931_v8 = vmax.f32 %v1913_v5, 0.0  ;;  %v2142_v5 = vpop.permute.xlu0 %2141 }
 0x337   : > { %v2806_v9 = vpack.c.bf16 %v1931_v8, %v1930_v7 }
 0x339   : > { %2807 = vmatprep.subr.bf16.mxu0 %v2806_v9 }
 0x33a   : > { %2809 = vmatpush3.bf16.msra.mxu0 %v2806_v9 }
 0x33d   : > { %2719 = vmatmul.mubr.f32.vlgmr.msra.gmra.mrb[36].mxu0 %v1933_v10 }
 0x33e   : > { %2721 = vmatprep.mubr.f32.mxu0 %v1934_v11 }
 0x341   : > { %2722 = vmatmul.mubr.f32.gmra.mrb[38].mxu0 %v1935_v12 }
 0x342   : > { %2724 = vmatprep.mubr.f32.mxu0 %v1936_v15 }
 0x345   : > { %2725 = vmatmul.mubr.f32.gmra.mrb[40].mxu0 %v1937_v17 }
 0x346   : > { %2727 = vmatprep.mubr.f32.mxu0 %v1938_v18  ;;  %v2184_v18 = vlaneseq }
 0x349   : > { %2728 = vmatmul.mubr.f32.gmra.mrb[42].mxu0 %v1939_v19 }
 0x410   : > { %v2720_v37 = vpop.f32.mrb[36].mxu0 }
 0x411   : > { %v2060_v30 = vadd.f32 %v2720_v37, %v1956_v20  ;;  %v2054_v32 = vpop.f32.mrb[37].mxu0 }
 0x412   : > { %v2055_v33 = vadd.f32 %v2054_v32, %v1951_v21  ;;  %v2185_v21 = vshrl.u32 %v2184_v18, 7 }
 0x413   : > { %v2094_v41 = vmax.f32 %v2060_v30, 0.0 }
 0x414   : > { %v2093_v42 = vmax.f32 %v2055_v33, 0.0  ;;  %v2723_v35 = vpop.f32.mrb[38].mxu0 }
 0x415   : > { %v2150_v45 = vmul.f32 %v2117_v25, %v2094_v41  ;;  %v2070_v39 = vadd.f32 %v2723_v35, %v1966_v23  ;;  %v2064_v6 = vpop.f32.mrb[39].mxu0  ;;  %v2186_v25 = vsub.s32 0, %v2185_v21 }
 0x416   : > { %v2149_v44 = vmul.f32 %v2112_v26, %v2093_v42  ;;  %v2065_v46 = vadd.f32 %v2064_v6, %v1961_v24 }
 0x417   : > { %v2158_v48 = vsel %vm542_vm0, %v2150_v45, 0.0  ;;  %v2096_v51 = vmax.f32 %v2070_v39, 0.0 }
 0x418   : > { %v2157_v49 = vsel %vm542_vm0, %v2149_v44, 0.0  ;;  %v2095_v52 = vmax.f32 %v2065_v46, 0.0  ;;  %v2726_v14 = vpop.f32.mrb[40].mxu0 }
 0x419   : > { %v2159_v55 = vadd.f32 %v2158_v48, %v2157_v49  ;;  %v2080_v50 = vadd.f32 %v2726_v14, %v1976_v29  ;;  %v2074_v59 = vpop.f32.mrb[41].mxu0  ;;  %v2152_v56 = vmul.f32 %v2127_v28, %v2096_v51 }
 0x41a   : > { %v2151_v53 = vmul.f32 %v2122_v27, %v2095_v52  ;;  %v2075_v61 = vadd.f32 %v2074_v59, %v1971_v36  ;;  %v2182_v27 = vpop.permute.xlu0 %2181 }
 0x41b   : > { %v2098_v54 = vmax.f32 %v2080_v50, 0.0  ;;  %v2162_v58 = vsel %vm542_vm0, %v2152_v56, 0.0  ;;  %v2187_v28 = vrot.slane %v2182_v27, %v2186_v25 }
 0x41c   : > { %v2160_v63 = vsel %vm542_vm0, %v2151_v53, 0.0  ;;  %v2097_v0 = vmax.f32 %v2075_v61, 0.0  ;;  %v2729_v57 = vpop.f32.mrb[42].mxu0 }
 0x41d   : > { %v2161_v1 = vadd.f32 %v2160_v63, %v2159_v55  ;;  %v2090_v31 = vadd.f32 %v2729_v57, %v1986_v62  ;;  %v2084_v2 = vpop.f32.mrb[43].mxu0  ;;  %v2154_v4 = vmul.f32 %v2137_v22, %v2098_v54 }
 0x41e   : > { %v2153_v3 = vmul.f32 %v2132_v34, %v2097_v0  ;;  %v2085_v13 = vadd.f32 %v2084_v2, %v1981_v38 }
 0x41f   : > { %v2163_v43 = vadd.f32 %v2162_v58, %v2161_v1  ;;  %v2100_v16 = vmax.f32 %v2090_v31, 0.0  ;;  %v2166_v8 = vsel %vm542_vm0, %v2154_v4, 0.0 }
 0x420   : > { %v2164_v40 = vsel %vm542_vm0, %v2153_v3, 0.0  ;;  %v2099_v47 = vmax.f32 %v2085_v13, 0.0 }
 0x421   : > { %v2165_v7 = vadd.f32 %v2164_v40, %v2163_v43  ;;  %v2156_v9 = vmul.f32 %v2147_v60, %v2100_v16 }
 0x422   : > { %v2155_v10 = vmul.f32 %v2142_v5, %v2099_v47 }
 0x423   : > { %v2167_v11 = vadd.f32 %v2166_v8, %v2165_v7  ;;  %v2170_v17 = vsel %vm542_vm0, %v2156_v9, 0.0 }
 0x424   : > { %v2168_v12 = vsel %vm542_vm0, %v2155_v10, 0.0 }
 0x425   : > { %v2169_v15 = vadd.f32 %v2168_v12, %v2167_v11 }
 0x427   : > { %v2171_v19 = vadd.f32 %v2170_v17, %v2169_v15 }
 0x429   : > { %v2172_v20 = vrot.slane %v2171_v19, 4 }
 0x42b   : > { %v2173_v23 = vadd.f32 %v2172_v20, %v2171_v19 }
 0x42d   : > { %v2174_v24 = vrot.slane %v2173_v23, 2 }
 0x42f   : > { %v2175_v26 = vadd.f32 %v2174_v24, %v2173_v23 }
 0x431   : > { %v2176_v36 = vrot.slane %v2175_v26, 1 }
 0x433   : > { %v2177_v29 = vadd.f32 %v2176_v36, %v2175_v26 }
 0x435   : > { %v2188_v37 = vadd.f32 %v2187_v28, %v2177_v29 }
 0x437   : > { %2190 = vst.msk [vmem:[%s492_s23] sm:$0x1] %vm2189_vm2, %v2188_v37 }
 0x438   : > { %2945 = shalt.err (!%p2942_p5)
}
 0x439   : > { %s2946_s16 = scalar_lea.hbm %s3777_s29, 16  ;;  %s2950_s23 = scalar_lea.hbm %s3837_s13, 32 }
 0x43a   : > { %p2947_p6 = scmp.ne.s32.totalorder %s3777_s29, %s2946_s16  ;;  %p2951_p10 = scmp.lt.u32.totalorder %s3777_s29, %s3837_s13 }
 0x43b   : > { %p2952_p11 = scmp.lt.u32.totalorder %s2950_s23, %s2946_s16  ;;  %p2954_p13 = scmp.lt.u32.totalorder %s2946_s16, %s3777_s29 }
 0x43c   : > { %p2948_p7 = pnand %p2947_p6, %p3127_p4 }
 0x43d   : > { %p2953_p12 = por %p2952_p11, %p2951_p10 }
 0x43e   : > { %p2949_p9 = pneg %p2948_p7 }
 0x43f   : > { %p2955_p0 = por %p2954_p13, %p2953_p12 }
 0x441   : > { %p2956_p1 = pnand %p2955_p0, %p2949_p9 }
 0x443   : > { %2959 = shalt.err (!%p2956_p1)
}
 0x444   : > { %2874 = dma.vmem_to_hbm [thread:$0]  (%p3127_p4), %s3779_s14, 16, %s3777_s29, %s2192_s17  }
 0x445 PF: > { %p2880_p2 = scmp.ge.s32.totalorder %s3010_s15, 2  ;;  %s2217_s22 = sand.u32 1, %s2990_s27  }
 0x446   : > { %s2218_s30 = scalar_lea.sflag [#allocation4], %s2217_s22 }
 0x447   : > { %p2877_p3 = pnand %p2880_p2, %p3134_p8 }
 0x449   : > { %2985 = dma.done.wait (!%p2877_p3), %s2218_s30, 16  }
 0x44a   : > { %2987 = vsyncadd (!%p2877_p3), %s2218_s30, 4294967280  ;;  %s28_s15 = sadd.s32 1, %s3010_s15   ;;  %s3847_s26 = sld [smem:[#allocation6_spill]] }
 0x44b   : > { %p25_p5 = scmp.ge.s32.totalorder %s28_s15, 4   ;;  %s3848_s29 = sld [smem:[#allocation9_spill]] }
 0x44c   : > { %s3849_s30 = sld [smem:[#allocation7_spill]]  ;;  %s3850_s14 = sld [smem:[#allocation8_spill]] }
 0x44d   : > { %s3851_s27 = smov %s2994_s28  ;;  %27 = sbr.rel (!%p25_p5) target bundleno = 7 (0x7), region = 113 }
 0x450   : > { %s3852_s28 = smov %s3847_s26 }
 0x454   :  { %2222 = vsyncpa [#allocation4], 1 }
 0x455   :  { %2224 = vsyncpa [#allocation4 + $0x1], 1 }

</bundles_post_ra>
